<compile_context>
chip_gen: v7x
topology: tpu7x:2x2x1
jax: 0.10.0
libtpu: 0.0.40
codegen_flags: <defaults>
</compile_context>

<pallas_src>
import jax
import jax.numpy as jnp
from jax.experimental import pallas as pl
from jax.experimental.pallas import tpu as pltpu

LATENT_DIM = 32
IN_DIM = 28 * 28  # 784


def _round_up(n, m):
    return ((n + m - 1) // m) * m


def _ae_kernel(x_ref,
               w1_ref, b1_ref, w2_ref, b2_ref, w3_ref, b3_ref,
               w4_ref, b4_ref, w5_ref, b5_ref, w6_ref, b6_ref,
               xhat_ref, z_ref):
    cdt = w1_ref.dtype          # compute dtype for MXU operands (bf16 or f32)
    # x arrives as f32 from HBM; cast on the VPU under the DMA (no extra XLA pass).
    x = x_ref[...].astype(cdt)  # (TB, 784)

    # ---- encoder (f32 MXU accumulation; elementwise in f32, cast before each dot) ----
    h = jnp.dot(x, w1_ref[...], preferred_element_type=jnp.float32) + b1_ref[...]
    h = jnp.maximum(h, 0.0).astype(cdt)                               # ReLU
    h = jnp.dot(h, w2_ref[...], preferred_element_type=jnp.float32) + b2_ref[...]
    h = jnp.maximum(h, 0.0).astype(cdt)                               # ReLU
    z = jnp.dot(h, w3_ref[...], preferred_element_type=jnp.float32) + b3_ref[...]
    z_ref[...] = z.astype(z_ref.dtype)

    # ---- decoder ----
    d = jnp.dot(z.astype(cdt), w4_ref[...], preferred_element_type=jnp.float32) + b4_ref[...]
    d = jnp.maximum(d, 0.0).astype(cdt)                               # ReLU
    d = jnp.dot(d, w5_ref[...], preferred_element_type=jnp.float32) + b5_ref[...]
    d = jnp.maximum(d, 0.0).astype(cdt)                               # ReLU
    d = jnp.dot(d, w6_ref[...], preferred_element_type=jnp.float32) + b6_ref[...]
    # Sigmoid via tanh -> EUP slot (mathematically identical to 1/(1+exp(-d))).
    xhat_ref[...] = (0.5 * (jnp.tanh(0.5 * d) + 1.0)).astype(xhat_ref.dtype)


def autoencoder_forward(x, params, *, tile_b=256, compute_dtype=jnp.bfloat16):
    """x: (B, 1, 28, 28) or (B, 784). Returns (x_hat, z) like the PyTorch module.

    params: list of 6 (W, b) pairs; W shape (in, out), b shape (1, out), f32.
    x_hat is returned in `compute_dtype`, z in float32.
    """
    x2d = x.reshape(-1, IN_DIM)                     # x.view(-1, 28*28) — metadata only
    if x2d.dtype != jnp.float32:
        x2d = x2d.astype(jnp.float32)
    B = x2d.shape[0]

    # Batch tile: multiple of 16 (safe sublane multiple for bf16/f32). No padding of
    # B — Pallas masks the partial final block on both input reads and output writes.
    tb = min(_round_up(max(tile_b, 16), 16), _round_up(B, 16))
    grid = (pl.cdiv(B, tb),)

    flat = []
    for (w, b) in params:
        flat.append(w.astype(compute_dtype))        # bf16 weights halve HBM/VMEM traffic
        flat.append(b.astype(jnp.float32))          # tiny, keep f32

    in_specs = [pl.BlockSpec((tb, IN_DIM), lambda i: (i, 0))]       # f32 x tile
    for arr in flat:
        # Whole weight/bias as one block with a constant index map: DMA'd once,
        # not re-fetched across grid steps. (<1 MiB total, double-buffering is noise.)
        in_specs.append(pl.BlockSpec(arr.shape, lambda i: (0, 0)))

    out_specs = [
        pl.BlockSpec((tb, IN_DIM), lambda i: (i, 0)),
        pl.BlockSpec((tb, LATENT_DIM), lambda i: (i, 0)),
    ]

    x_hat, z = pl.pallas_call(
        _ae_kernel,
        out_shape=(
            jax.ShapeDtypeStruct((B, IN_DIM), compute_dtype),   # bf16 x_hat: biggest stream
            jax.ShapeDtypeStruct((B, LATENT_DIM), jnp.float32),
        ),
        grid=grid,
        in_specs=in_specs,
        out_specs=out_specs,
        compiler_params=pltpu.CompilerParams(
            dimension_semantics=("parallel",),      # batch tiles shard across TCs (v7x)
            # No vmem_limit override: working set is only a few MiB per tile.
        ),
    )(x2d, *flat)

    return x_hat, z


def init_params(key):
    """Deterministic init mimicking nn.Linear default (U[-1/sqrt(fan_in), +])."""
    dims = [(IN_DIM, 128), (128, 64), (64, LATENT_DIM),
            (LATENT_DIM, 64), (64, 128), (128, IN_DIM)]
    params = []
    for (fan_in, fan_out) in dims:
        key, kw, kb = jax.random.split(key, 3)
        bound = 1.0 / jnp.sqrt(fan_in)
        w = jax.random.uniform(kw, (fan_in, fan_out), jnp.float32, -bound, bound)
        b = jax.random.uniform(kb, (1, fan_out), jnp.float32, -bound, bound)
        params.append((w, b))
    return params


def reference_forward(x, params):
    """Plain-JAX reference for correctness check."""
    x2d = x.reshape(-1, IN_DIM).astype(jnp.float32)
    (w1, b1), (w2, b2), (w3, b3), (w4, b4), (w5, b5), (w6, b6) = params
    h = jax.nn.relu(x2d @ w1 + b1)
    h = jax.nn.relu(h @ w2 + b2)
    z = h @ w3 + b3
    d = jax.nn.relu(z @ w4 + b4)
    d = jax.nn.relu(d @ w5 + b5)
    x_hat = jax.nn.sigmoid(d @ w6 + b6)
    return x_hat, z


if __name__ == "__main__":
    key = jax.random.PRNGKey(0)
    key, kx = jax.random.split(key)

    # Small batch, deliberately not a multiple of 16 or of the tile -> exercises
    # the masked partial-block path (no pad / slice passes in the wrapper).
    B = 37
    x = jax.random.uniform(kx, (B, 1, 28, 28), jnp.float32)  # MNIST-like input
    params = init_params(key)

    x_hat_ref, z_ref = reference_forward(x, params)

    # Performance path: bf16 MXU operands, f32 accumulation, bf16 x_hat output.
    x_hat, z = autoencoder_forward(x, params)
    jax.block_until_ready((x_hat, z))
    assert x_hat.shape == (B, IN_DIM) and z.shape == (B, LATENT_DIM)
    assert jnp.allclose(x_hat.astype(jnp.float32), x_hat_ref, atol=3e-2, rtol=3e-2)
    assert jnp.allclose(z, z_ref, atol=3e-2, rtol=3e-2)

    # Full-f32 path: tight check against the plain-JAX reference.
    x_hat32, z32 = autoencoder_forward(x, params, compute_dtype=jnp.float32)
    jax.block_until_ready((x_hat32, z32))
    assert jnp.allclose(x_hat32, x_hat_ref, atol=1e-5, rtol=1e-5)
    assert jnp.allclose(z32, z_ref, atol=1e-4, rtol=1e-4)

    print("KERNEL_OK")
</pallas_src>

<mosaic_0001>
module attributes {stable_mosaic.version = 11 : i64} {
  func.func @_ae_kernel(%arg0: i32, %arg1: memref<48x784xf32, #tpu.memory_space<vmem>>, %arg2: memref<784x128xbf16, #tpu.memory_space<vmem>>, %arg3: memref<1x128xf32, #tpu.memory_space<vmem>>, %arg4: memref<128x64xbf16, #tpu.memory_space<vmem>>, %arg5: memref<1x64xf32, #tpu.memory_space<vmem>>, %arg6: memref<64x32xbf16, #tpu.memory_space<vmem>>, %arg7: memref<1x32xf32, #tpu.memory_space<vmem>>, %arg8: memref<32x64xbf16, #tpu.memory_space<vmem>>, %arg9: memref<1x64xf32, #tpu.memory_space<vmem>>, %arg10: memref<64x128xbf16, #tpu.memory_space<vmem>>, %arg11: memref<1x128xf32, #tpu.memory_space<vmem>>, %arg12: memref<128x784xbf16, #tpu.memory_space<vmem>>, %arg13: memref<1x784xf32, #tpu.memory_space<vmem>>, %arg14: memref<48x784xbf16, #tpu.memory_space<vmem>>, %arg15: memref<48x32xf32, #tpu.memory_space<vmem>>) attributes {dimension_semantics = [#tpu.dimension_semantics<parallel>], iteration_bounds = array<i64: 1>, scalar_prefetch = 0 : i64, scratch_operands = 0 : i64, tpu.core_type = #tpu.core_type<tc>, window_params = [{transform_indices = @transform_0, window_bounds = array<i64: 48, 784>}, {pipeline_mode = #tpu.pipeline_mode<synchronous>, transform_indices = @transform_1, window_bounds = array<i64: 784, 128>}, {pipeline_mode = #tpu.pipeline_mode<synchronous>, transform_indices = @transform_2, window_bounds = array<i64: 1, 128>}, {pipeline_mode = #tpu.pipeline_mode<synchronous>, transform_indices = @transform_3, window_bounds = array<i64: 128, 64>}, {pipeline_mode = #tpu.pipeline_mode<synchronous>, transform_indices = @transform_4, window_bounds = array<i64: 1, 64>}, {pipeline_mode = #tpu.pipeline_mode<synchronous>, transform_indices = @transform_5, window_bounds = array<i64: 64, 32>}, {pipeline_mode = #tpu.pipeline_mode<synchronous>, transform_indices = @transform_6, window_bounds = array<i64: 1, 32>}, {pipeline_mode = #tpu.pipeline_mode<synchronous>, transform_indices = @transform_7, window_bounds = array<i64: 32, 64>}, {pipeline_mode = #tpu.pipeline_mode<synchronous>, transform_indices = @transform_8, window_bounds = array<i64: 1, 64>}, {pipeline_mode = #tpu.pipeline_mode<synchronous>, transform_indices = @transform_9, window_bounds = array<i64: 64, 128>}, {pipeline_mode = #tpu.pipeline_mode<synchronous>, transform_indices = @transform_10, window_bounds = array<i64: 1, 128>}, {pipeline_mode = #tpu.pipeline_mode<synchronous>, transform_indices = @transform_11, window_bounds = array<i64: 128, 784>}, {pipeline_mode = #tpu.pipeline_mode<synchronous>, transform_indices = @transform_12, window_bounds = array<i64: 1, 784>}, {transform_indices = @transform_13, window_bounds = array<i64: 48, 784>}, {transform_indices = @transform_14, window_bounds = array<i64: 48, 32>}]} {
    %c0 = arith.constant 0 : index
    %c0_0 = arith.constant 0 : index
    %0 = vector.load %arg1[%c0, %c0_0] : memref<48x784xf32, #tpu.memory_space<vmem>>, vector<48x784xf32>
    %1 = arith.truncf %0 : vector<48x784xf32> to vector<48x784xbf16>
    %c0_1 = arith.constant 0 : index
    %c0_2 = arith.constant 0 : index
    %2 = vector.load %arg2[%c0_1, %c0_2] : memref<784x128xbf16, #tpu.memory_space<vmem>>, vector<784x128xbf16>
    %cst = arith.constant dense<0.000000e+00> : vector<48x128xf32>
    %3 = tpu.matmul %1, %2, %cst {dimension_numbers = #tpu.dot_dimension_numbers<[1], [0], [0], [1], [0, 0, 1, 1], [], []>} : vector<48x784xbf16>, vector<784x128xbf16>, vector<48x128xf32> -> vector<48x128xf32>
    %c0_3 = arith.constant 0 : index
    %c0_4 = arith.constant 0 : index
    %4 = vector.load %arg3[%c0_3, %c0_4] : memref<1x128xf32, #tpu.memory_space<vmem>>, vector<1x128xf32>
    %5 = vector.broadcast %4 : vector<1x128xf32> to vector<48x128xf32>
    %6 = arith.addf %3, %5 : vector<48x128xf32>
    %cst_5 = arith.constant 0.000000e+00 : f32
    %7 = vector.broadcast %cst_5 : f32 to vector<48x128xf32>
    %8 = arith.maximumf %6, %7 : vector<48x128xf32>
    %9 = arith.truncf %8 : vector<48x128xf32> to vector<48x128xbf16>
    %c0_6 = arith.constant 0 : index
    %c0_7 = arith.constant 0 : index
    %10 = vector.load %arg4[%c0_6, %c0_7] : memref<128x64xbf16, #tpu.memory_space<vmem>>, vector<128x64xbf16>
    %cst_8 = arith.constant dense<0.000000e+00> : vector<48x64xf32>
    %11 = tpu.matmul %9, %10, %cst_8 {dimension_numbers = #tpu.dot_dimension_numbers<[1], [0], [0], [1], [0, 0, 1, 1], [], []>} : vector<48x128xbf16>, vector<128x64xbf16>, vector<48x64xf32> -> vector<48x64xf32>
    %c0_9 = arith.constant 0 : index
    %c0_10 = arith.constant 0 : index
    %12 = vector.load %arg5[%c0_9, %c0_10] : memref<1x64xf32, #tpu.memory_space<vmem>>, vector<1x64xf32>
    %13 = vector.broadcast %12 : vector<1x64xf32> to vector<48x64xf32>
    %14 = arith.addf %11, %13 : vector<48x64xf32>
    %cst_11 = arith.constant 0.000000e+00 : f32
    %15 = vector.broadcast %cst_11 : f32 to vector<48x64xf32>
    %16 = arith.maximumf %14, %15 : vector<48x64xf32>
    %17 = arith.truncf %16 : vector<48x64xf32> to vector<48x64xbf16>
    %c0_12 = arith.constant 0 : index
    %c0_13 = arith.constant 0 : index
    %18 = vector.load %arg6[%c0_12, %c0_13] : memref<64x32xbf16, #tpu.memory_space<vmem>>, vector<64x32xbf16>
    %cst_14 = arith.constant dense<0.000000e+00> : vector<48x32xf32>
    %19 = tpu.matmul %17, %18, %cst_14 {dimension_numbers = #tpu.dot_dimension_numbers<[1], [0], [0], [1], [0, 0, 1, 1], [], []>} : vector<48x64xbf16>, vector<64x32xbf16>, vector<48x32xf32> -> vector<48x32xf32>
    %c0_15 = arith.constant 0 : index
    %c0_16 = arith.constant 0 : index
    %20 = vector.load %arg7[%c0_15, %c0_16] : memref<1x32xf32, #tpu.memory_space<vmem>>, vector<1x32xf32>
    %21 = vector.broadcast %20 : vector<1x32xf32> to vector<48x32xf32>
    %22 = arith.addf %19, %21 : vector<48x32xf32>
    %c0_17 = arith.constant 0 : index
    %c0_18 = arith.constant 0 : index
    %23 = vector.load %arg15[%c0_17, %c0_18] : memref<48x32xf32, #tpu.memory_space<vmem>>, vector<48x32xf32>
    tpu.vector_store %arg15[%c0_17, %c0_18], %22 {strides = array<i32>} : memref<48x32xf32, #tpu.memory_space<vmem>>, vector<48x32xf32>,
    %24 = arith.truncf %22 : vector<48x32xf32> to vector<48x32xbf16>
    %c0_19 = arith.constant 0 : index
    %c0_20 = arith.constant 0 : index
    %25 = vector.load %arg8[%c0_19, %c0_20] : memref<32x64xbf16, #tpu.memory_space<vmem>>, vector<32x64xbf16>
    %cst_21 = arith.constant dense<0.000000e+00> : vector<48x64xf32>
    %26 = tpu.matmul %24, %25, %cst_21 {dimension_numbers = #tpu.dot_dimension_numbers<[1], [0], [0], [1], [0, 0, 1, 1], [], []>} : vector<48x32xbf16>, vector<32x64xbf16>, vector<48x64xf32> -> vector<48x64xf32>
    %c0_22 = arith.constant 0 : index
    %c0_23 = arith.constant 0 : index
    %27 = vector.load %arg9[%c0_22, %c0_23] : memref<1x64xf32, #tpu.memory_space<vmem>>, vector<1x64xf32>
    %28 = vector.broadcast %27 : vector<1x64xf32> to vector<48x64xf32>
    %29 = arith.addf %26, %28 : vector<48x64xf32>
    %cst_24 = arith.constant 0.000000e+00 : f32
    %30 = vector.broadcast %cst_24 : f32 to vector<48x64xf32>
    %31 = arith.maximumf %29, %30 : vector<48x64xf32>
    %32 = arith.truncf %31 : vector<48x64xf32> to vector<48x64xbf16>
    %c0_25 = arith.constant 0 : index
    %c0_26 = arith.constant 0 : index
    %33 = vector.load %arg10[%c0_25, %c0_26] : memref<64x128xbf16, #tpu.memory_space<vmem>>, vector<64x128xbf16>
    %cst_27 = arith.constant dense<0.000000e+00> : vector<48x128xf32>
    %34 = tpu.matmul %32, %33, %cst_27 {dimension_numbers = #tpu.dot_dimension_numbers<[1], [0], [0], [1], [0, 0, 1, 1], [], []>} : vector<48x64xbf16>, vector<64x128xbf16>, vector<48x128xf32> -> vector<48x128xf32>
    %c0_28 = arith.constant 0 : index
    %c0_29 = arith.constant 0 : index
    %35 = vector.load %arg11[%c0_28, %c0_29] : memref<1x128xf32, #tpu.memory_space<vmem>>, vector<1x128xf32>
    %36 = vector.broadcast %35 : vector<1x128xf32> to vector<48x128xf32>
    %37 = arith.addf %34, %36 : vector<48x128xf32>
    %cst_30 = arith.constant 0.000000e+00 : f32
    %38 = vector.broadcast %cst_30 : f32 to vector<48x128xf32>
    %39 = arith.maximumf %37, %38 : vector<48x128xf32>
    %40 = arith.truncf %39 : vector<48x128xf32> to vector<48x128xbf16>
    %c0_31 = arith.constant 0 : index
    %c0_32 = arith.constant 0 : index
    %41 = vector.load %arg12[%c0_31, %c0_32] : memref<128x784xbf16, #tpu.memory_space<vmem>>, vector<128x784xbf16>
    %cst_33 = arith.constant dense<0.000000e+00> : vector<48x784xf32>
    %42 = tpu.matmul %40, %41, %cst_33 {dimension_numbers = #tpu.dot_dimension_numbers<[1], [0], [0], [1], [0, 0, 1, 1], [], []>} : vector<48x128xbf16>, vector<128x784xbf16>, vector<48x784xf32> -> vector<48x784xf32>
    %c0_34 = arith.constant 0 : index
    %c0_35 = arith.constant 0 : index
    %43 = vector.load %arg13[%c0_34, %c0_35] : memref<1x784xf32, #tpu.memory_space<vmem>>, vector<1x784xf32>
    %44 = vector.broadcast %43 : vector<1x784xf32> to vector<48x784xf32>
    %45 = arith.addf %42, %44 : vector<48x784xf32>
    %cst_36 = arith.constant 5.000000e-01 : f32
    %46 = vector.broadcast %cst_36 : f32 to vector<48x784xf32>
    %47 = arith.mulf %46, %45 : vector<48x784xf32>
    %48 = math.tanh %47 : vector<48x784xf32>
    %cst_37 = arith.constant 1.000000e+00 : f32
    %49 = vector.broadcast %cst_37 : f32 to vector<48x784xf32>
    %50 = arith.addf %48, %49 : vector<48x784xf32>
    %cst_38 = arith.constant 5.000000e-01 : f32
    %51 = vector.broadcast %cst_38 : f32 to vector<48x784xf32>
    %52 = arith.mulf %51, %50 : vector<48x784xf32>
    %53 = arith.truncf %52 : vector<48x784xf32> to vector<48x784xbf16>
    %c0_39 = arith.constant 0 : index
    %c0_40 = arith.constant 0 : index
    %54 = vector.load %arg14[%c0_39, %c0_40] : memref<48x784xbf16, #tpu.memory_space<vmem>>, vector<48x784xbf16>
    tpu.vector_store %arg14[%c0_39, %c0_40], %53 {strides = array<i32>} : memref<48x784xbf16, #tpu.memory_space<vmem>>, vector<48x784xbf16>,
    return
  }
  func.func @transform_0(%arg0: i32) -> (i32, i32) {
    %c0_i32 = arith.constant 0 : i32
    %c0_i32_0 = arith.constant 0 : i32
    return %arg0, %c0_i32 : i32, i32
  }
  func.func @transform_1(%arg0: i32) -> (i32, i32) {
    %c0_i32 = arith.constant 0 : i32
    %c0_i32_0 = arith.constant 0 : i32
    %c0_i32_1 = arith.constant 0 : i32
    return %c0_i32, %c0_i32_0 : i32, i32
  }
  func.func @transform_2(%arg0: i32) -> (i32, i32) {
    %c0_i32 = arith.constant 0 : i32
    %c0_i32_0 = arith.constant 0 : i32
    %c0_i32_1 = arith.constant 0 : i32
    return %c0_i32, %c0_i32_0 : i32, i32
  }
  func.func @transform_3(%arg0: i32) -> (i32, i32) {
    %c0_i32 = arith.constant 0 : i32
    %c0_i32_0 = arith.constant 0 : i32
    %c0_i32_1 = arith.constant 0 : i32
    return %c0_i32, %c0_i32_0 : i32, i32
  }
  func.func @transform_4(%arg0: i32) -> (i32, i32) {
    %c0_i32 = arith.constant 0 : i32
    %c0_i32_0 = arith.constant 0 : i32
    %c0_i32_1 = arith.constant 0 : i32
    return %c0_i32, %c0_i32_0 : i32, i32
  }
  func.func @transform_5(%arg0: i32) -> (i32, i32) {
    %c0_i32 = arith.constant 0 : i32
    %c0_i32_0 = arith.constant 0 : i32
    %c0_i32_1 = arith.constant 0 : i32
    return %c0_i32, %c0_i32_0 : i32, i32
  }
  func.func @transform_6(%arg0: i32) -> (i32, i32) {
    %c0_i32 = arith.constant 0 : i32
    %c0_i32_0 = arith.constant 0 : i32
    %c0_i32_1 = arith.constant 0 : i32
    return %c0_i32, %c0_i32_0 : i32, i32
  }
  func.func @transform_7(%arg0: i32) -> (i32, i32) {
    %c0_i32 = arith.constant 0 : i32
    %c0_i32_0 = arith.constant 0 : i32
    %c0_i32_1 = arith.constant 0 : i32
    return %c0_i32, %c0_i32_0 : i32, i32
  }
  func.func @transform_8(%arg0: i32) -> (i32, i32) {
    %c0_i32 = arith.constant 0 : i32
    %c0_i32_0 = arith.constant 0 : i32
    %c0_i32_1 = arith.constant 0 : i32
    return %c0_i32, %c0_i32_0 : i32, i32
  }
  func.func @transform_9(%arg0: i32) -> (i32, i32) {
    %c0_i32 = arith.constant 0 : i32
    %c0_i32_0 = arith.constant 0 : i32
    %c0_i32_1 = arith.constant 0 : i32
    return %c0_i32, %c0_i32_0 : i32, i32
  }
  func.func @transform_10(%arg0: i32) -> (i32, i32) {
    %c0_i32 = arith.constant 0 : i32
    %c0_i32_0 = arith.constant 0 : i32
    %c0_i32_1 = arith.constant 0 : i32
    return %c0_i32, %c0_i32_0 : i32, i32
  }
  func.func @transform_11(%arg0: i32) -> (i32, i32) {
    %c0_i32 = arith.constant 0 : i32
    %c0_i32_0 = arith.constant 0 : i32
    %c0_i32_1 = arith.constant 0 : i32
    return %c0_i32, %c0_i32_0 : i32, i32
  }
  func.func @transform_12(%arg0: i32) -> (i32, i32) {
    %c0_i32 = arith.constant 0 : i32
    %c0_i32_0 = arith.constant 0 : i32
    %c0_i32_1 = arith.constant 0 : i32
    return %c0_i32, %c0_i32_0 : i32, i32
  }
  func.func @transform_13(%arg0: i32) -> (i32, i32) {
    %c0_i32 = arith.constant 0 : i32
    %c0_i32_0 = arith.constant 0 : i32
    return %arg0, %c0_i32 : i32, i32
  }
  func.func @transform_14(%arg0: i32) -> (i32, i32) {
    %c0_i32 = arith.constant 0 : i32
    %c0_i32_0 = arith.constant 0 : i32
    return %arg0, %c0_i32 : i32, i32
  }
}

</mosaic_0001>

<bundles_post_ra>
// kernel: tpu_custom_call.1
= control target key start
LH: loop header
LB: loop body
LE: loop exit
PB: predicated region body
PF: predicated region fallthrough
CT: control target
= control target key end

     0   :  { %20 = vsyncpa [#allocation3], 0  ;;  %v2976_v41 = vmov 0.0   ;;  %vm2977_vm0 = vmmov 0   ;;  %vm510_vm1 = vcmask 130048   ;;  %vm933_vm2 = vcmask 523264   ;;  %s3777_s0 = inlined_call_operand.vmem [shape: f32[37,784], index: 0, kind: input, shape index: {}]   ;;  %s3778_s1 = inlined_call_operand.vmem [shape: bf16[784,128], index: 1, kind: input, shape index: {}]   ;;  %s3779_s2 = inlined_call_operand.vmem [shape: f32[1,128], index: 2, kind: input, shape index: {}]   ;;  %s3780_s3 = inlined_call_operand.vmem [shape: bf16[128,64], index: 3, kind: input, shape index: {}]   ;;  %s3781_s4 = inlined_call_operand.vmem [shape: f32[1,64], index: 4, kind: input, shape index: {}]   ;;  %s3782_s5 = inlined_call_operand.vmem [shape: bf16[64,32], index: 5, kind: input, shape index: {}]   ;;  %s3783_s6 = inlined_call_operand.vmem [shape: f32[1,32], index: 6, kind: input, shape index: {}]   ;;  %s3784_s7 = inlined_call_operand.vmem [shape: bf16[32,64], index: 7, kind: input, shape index: {}]   ;;  %s3785_s8 = inlined_call_operand.vmem [shape: f32[1,64], index: 8, kind: input, shape index: {}]   ;;  %s3786_s9 = inlined_call_operand.vmem [shape: bf16[64,128], index: 9, kind: input, shape index: {}]   ;;  %s3787_s10 = inlined_call_operand.vmem [shape: f32[1,128], index: 10, kind: input, shape index: {}]   ;;  %s3788_s11 = inlined_call_operand.vmem [shape: bf16[128,784], index: 11, kind: input, shape index: {}]   ;;  %s3789_s12 = inlined_call_operand.vmem [shape: f32[1,784], index: 12, kind: input, shape index: {}]   ;;  %s3790_s13 = inlined_call_operand.hbm [shape: bf16[37,784], index: 13, kind: output, shape index: {0}]   ;;  %s3791_s14 = inlined_call_operand.vmem [shape: f32[37,32], index: 14, kind: output, shape index: {1}]  }
   0x1   :  { %v2721_v0 = vld [vmem:[%s3778_s1 + $0x40] sm:$0xff]   ;;  %v2725_v4 = vld [vmem:[%s3778_s1 + $0x48] sm:$0xff]   ;;  %v2729_v8 = vld [vmem:[%s3778_s1 + $0x50] sm:$0xff]   ;;  %vm1000_vm3 = vcmask 261120   ;;  %vm2160_vm4 = vcmask 125952  }
   0x2   :  { %v2722_v1 = vld [vmem:[%s3778_s1] sm:$0xff]   ;;  %2442 = vmatprep.subr.bf16.mxu0 %v2721_v0  ;;  %v2726_v5 = vld [vmem:[%s3778_s1 + $0x8] sm:$0xff]   ;;  %v2730_v9 = vld [vmem:[%s3778_s1 + $0x10] sm:$0xff]  }
   0x3   :  { %v2723_v2 = vld [vmem:[%s3778_s1 + $0xc0] sm:$0xff]   ;;  %2443 = vmatpush3.bf16.msra.mxu0 %v2722_v1  ;;  %v2727_v6 = vld [vmem:[%s3778_s1 + $0xc8] sm:$0xff]   ;;  %v2731_v10 = vld [vmem:[%s3778_s1 + $0xd0] sm:$0xff]  }
   0x4   :  { %v2724_v3 = vld [vmem:[%s3778_s1 + $0x80] sm:$0xff]   ;;  %2476 = vmatprep.subr.bf16.mxu1 %v2723_v2  ;;  %2444 = vmatprep.subr.bf16.mxu0 %v2725_v4  ;;  %v2728_v7 = vld [vmem:[%s3778_s1 + $0x88] sm:$0xff]   ;;  %v2732_v11 = vld [vmem:[%s3778_s1 + $0x90] sm:$0xff]  }
   0x5   :  { %2477 = vmatpush3.bf16.msra.mxu1 %v2724_v3  ;;  %v2733_v12 = vld [vmem:[%s3778_s1 + $0x58] sm:$0xff]   ;;  %v2737_v16 = vld [vmem:[%s3778_s1 + $0x60] sm:$0xff]   ;;  %v2741_v20 = vld [vmem:[%s3778_s1 + $0x68] sm:$0xff]  }
   0x6   :  { %2478 = vmatprep.subr.bf16.mxu1 %v2727_v6  ;;  %v2734_v13 = vld [vmem:[%s3778_s1 + $0x18] sm:$0xff]   ;;  %v2738_v17 = vld [vmem:[%s3778_s1 + $0x20] sm:$0xff]   ;;  %v2742_v21 = vld [vmem:[%s3778_s1 + $0x28] sm:$0xff]  }
   0x7   :  { %2445 = vmatpush3.bf16.msra.mxu0 %v2726_v5  ;;  %v2735_v14 = vld [vmem:[%s3778_s1 + $0xd8] sm:$0xff]   ;;  %v2739_v18 = vld [vmem:[%s3778_s1 + $0xe0] sm:$0xff]   ;;  %v2743_v22 = vld [vmem:[%s3778_s1 + $0xe8] sm:$0xff]  }
   0x8   :  { %2446 = vmatprep.subr.bf16.mxu0 %v2729_v8  ;;  %v2736_v15 = vld [vmem:[%s3778_s1 + $0x98] sm:$0xff]   ;;  %v2740_v19 = vld [vmem:[%s3778_s1 + $0xa0] sm:$0xff]   ;;  %v2744_v23 = vld [vmem:[%s3778_s1 + $0xa8] sm:$0xff]  }
   0x9   :  { %2479 = vmatpush3.bf16.msra.mxu1 %v2728_v7  ;;  %v2745_v24 = vld [vmem:[%s3778_s1 + $0x70] sm:$0xff]   ;;  %v2749_v28 = vld [vmem:[%s3778_s1 + $0x78] sm:$0xff]   ;;  %v49_v31 = vld [vmem:[%s3777_s0 + $0x8] sm:$0xff] }
   0xa   :  { %2480 = vmatprep.subr.bf16.mxu1 %v2731_v10  ;;  %v2746_v25 = vld [vmem:[%s3778_s1 + $0x30] sm:$0xff]   ;;  %v2750_v29 = vld [vmem:[%s3778_s1 + $0x38] sm:$0xff]   ;;  %v56_v32 = vld [vmem:[%s3777_s0 + $0x40] sm:$0xff] }
   0xb   :  { %2447 = vmatpush3.bf16.msra.mxu0 %v2730_v9  ;;  %v2747_v26 = vld [vmem:[%s3778_s1 + $0xf0] sm:$0xff]   ;;  %v2751_v30 = vld [vmem:[%s3778_s1 + $0xf8] sm:$0xff]   ;;  %v91_v33 = vpack.c.bf16 %v56_v32, %v49_v31  ;;  %v48_v35 = vld [vmem:[%s3777_s0] sm:$0xff] }
   0xc   :  { %2448 = vmatprep.subr.bf16.mxu0 %v2733_v12  ;;  %v2748_v27 = vld [vmem:[%s3778_s1 + $0xb0] sm:$0xff]   ;;  %v2752_v34 = vld [vmem:[%s3778_s1 + $0xb8] sm:$0xff]   ;;  %v2753_v38 = vld [vmem:[%s3778_s1 + $0x140] sm:$0xff]  }
   0xd   :  { %2481 = vmatpush3.bf16.msra.mxu1 %v2732_v11  ;;  %v55_v36 = vld [vmem:[%s3777_s0 + $0x38] sm:$0xff]  ;;  %552 = vmatprep.mubr.bf16.mxu0 %v91_v33  ;;  %v58_v40 = vld [vmem:[%s3777_s0 + $0x50] sm:$0xff]  ;;  %v2754_v43 = vld [vmem:[%s3778_s1 + $0x100] sm:$0xff]  }
   0xe   :  { %2482 = vmatprep.subr.bf16.mxu1 %v2735_v14  ;;  %v90_v37 = vpack.c.bf16 %v55_v36, %v48_v35  ;;  %v51_v39 = vld [vmem:[%s3777_s0 + $0x18] sm:$0xff]  ;;  %v50_v44 = vld [vmem:[%s3777_s0 + $0x10] sm:$0xff]  ;;  %v57_v45 = vld [vmem:[%s3777_s0 + $0x48] sm:$0xff] }
   0xf   :  { %2449 = vmatpush3.bf16.msra.mxu0 %v2734_v13  ;;  %v93_v42 = vpack.c.bf16 %v58_v40, %v51_v39  ;;  %v92_v46 = vpack.c.bf16 %v57_v45, %v50_v44  ;;  %v2755_v47 = vld [vmem:[%s3778_s1 + $0x148] sm:$0xff]   ;;  %v2757_v49 = vld [vmem:[%s3778_s1 + $0x150] sm:$0xff]   ;;  %v63_v51 = vld [vmem:[%s3777_s0 + $0x78] sm:$0xff] }
  0x10   :  { %2450 = vmatprep.subr.bf16.mxu0 %v2737_v16  ;;  %v2756_v48 = vld [vmem:[%s3778_s1 + $0x108] sm:$0xff]   ;;  %v2758_v50 = vld [vmem:[%s3778_s1 + $0x110] sm:$0xff]   ;;  %v2759_v54 = vld [vmem:[%s3778_s1 + $0x158] sm:$0xff]  }
  0x11   :  { %2483 = vmatpush3.bf16.msra.mxu1 %v2736_v15  ;;  %609 = vmatprep.mubr.bf16.mxu1 %v93_v42  ;;  %v70_v52 = vld [vmem:[%s3777_s0 + $0xb0] sm:$0xff]  ;;  %v69_v56 = vld [vmem:[%s3777_s0 + $0xa8] sm:$0xff]  ;;  %v2760_v58 = vld [vmem:[%s3778_s1 + $0x118] sm:$0xff]  }
  0x12   :  { %2484 = vmatprep.subr.bf16.mxu1 %v2739_v18  ;;  %v98_v53 = vpack.c.bf16 %v70_v52, %v63_v51  ;;  %v62_v55 = vld [vmem:[%s3777_s0 + $0x70] sm:$0xff]  ;;  %v2761_v59 = vld [vmem:[%s3778_s1 + $0x180] sm:$0xff]   ;;  %v65_v60 = vld [vmem:[%s3777_s0 + $0x88] sm:$0xff] }
  0x13   :  { %2451 = vmatpush3.bf16.msra.mxu0 %v2738_v17  ;;  %v97_v57 = vpack.c.bf16 %v69_v56, %v62_v55  ;;  %v72_v61 = vld [vmem:[%s3777_s0 + $0xc0] sm:$0xff]  ;;  %v71_v0 = vld [vmem:[%s3777_s0 + $0xb8] sm:$0xff]  ;;  %v77_v3 = vld [vmem:[%s3777_s0 + $0xe8] sm:$0xff] }
  0x14   :  { %2452 = vmatprep.subr.bf16.mxu0 %v2741_v20  ;;  %v100_v62 = vpack.c.bf16 %v72_v61, %v65_v60  ;;  %v64_v63 = vld [vmem:[%s3777_s0 + $0x80] sm:$0xff]  ;;  %v83_v8 = vld [vmem:[%s3777_s0 + $0x118] sm:$0xff]  ;;  %v2764_v9 = vld [vmem:[%s3778_s1 + $0x168] sm:$0xff]  }
  0x15   :  { %2485 = vmatpush3.bf16.msra.mxu1 %v2740_v19  ;;  %v99_v1 = vpack.c.bf16 %v71_v0, %v64_v63  ;;  %v2762_v2 = vld [vmem:[%s3778_s1 + $0x160] sm:$0xff]   ;;  %v79_v11 = vld [vmem:[%s3777_s0 + $0xf8] sm:$0xff]  ;;  %v86_v12 = vld [vmem:[%s3777_s0 + $0x130] sm:$0xff] }
  0x16   :  { %2486 = vmatprep.subr.bf16.mxu1 %v2743_v22  ;;  %v84_v4 = vld [vmem:[%s3777_s0 + $0x120] sm:$0xff]  ;;  %v78_v13 = vld [vmem:[%s3777_s0 + $0xf0] sm:$0xff]  ;;  %v107_v14 = vpack.c.bf16 %v86_v12, %v79_v11  ;;  %v85_v15 = vld [vmem:[%s3777_s0 + $0x128] sm:$0xff] }
  0x17   :  { %2453 = vmatpush3.bf16.msra.mxu0 %v2742_v21  ;;  %v2763_v5 = vld [vmem:[%s3778_s1 + $0x120] sm:$0xff]   ;;  %v105_v6 = vpack.c.bf16 %v84_v4, %v77_v3  ;;  %v2765_v16 = vld [vmem:[%s3778_s1 + $0x128] sm:$0xff]   ;;  %v106_v17 = vpack.c.bf16 %v85_v15, %v78_v13  ;;  %v2766_v18 = vld [vmem:[%s3778_s1 + $0x170] sm:$0xff]  }
  0x18   :  { %2454 = vmatprep.subr.bf16.mxu0 %v2745_v24  ;;  %v76_v7 = vld [vmem:[%s3777_s0 + $0xe0] sm:$0xff]  ;;  %v53_v19 = vld [vmem:[%s3777_s0 + $0x28] sm:$0xff]  ;;  %v2767_v21 = vld [vmem:[%s3778_s1 + $0x130] sm:$0xff]  }
  0x19   :  { %2487 = vmatpush3.bf16.msra.mxu1 %v2744_v23  ;;  %v104_v10 = vpack.c.bf16 %v83_v8, %v76_v7  ;;  %v60_v20 = vld [vmem:[%s3777_s0 + $0x60] sm:$0xff]  ;;  %v54_v23 = vld [vmem:[%s3777_s0 + $0x30] sm:$0xff]  ;;  %v2768_v24 = vld [vmem:[%s3778_s1 + $0x178] sm:$0xff]  }
  0x1a   :  { %2488 = vmatprep.subr.bf16.mxu1 %v2747_v26  ;;  %v95_v22 = vpack.c.bf16 %v60_v20, %v53_v19  ;;  %v2769_v26 = vld [vmem:[%s3778_s1 + $0x138] sm:$0xff]   ;;  %v74_v31 = vld [vmem:[%s3777_s0 + $0xd0] sm:$0xff]  ;;  %v68_v32 = vld [vmem:[%s3777_s0 + $0xa0] sm:$0xff] }
  0x1b   :  { %2455 = vmatpush3.bf16.msra.mxu0 %v2746_v25  ;;  %v61_v25 = vld [vmem:[%s3777_s0 + $0x68] sm:$0xff]  ;;  %v75_v33 = vld [vmem:[%s3777_s0 + $0xd8] sm:$0xff]  ;;  %v66_v36 = vld [vmem:[%s3777_s0 + $0x90] sm:$0xff] }
  0x1c   :  { %2456 = vmatprep.subr.bf16.mxu0 %v2749_v28  ;;  %v52_v28 = vld [vmem:[%s3777_s0 + $0x20] sm:$0xff]  ;;  %v81_v39 = vld [vmem:[%s3777_s0 + $0x108] sm:$0xff]  ;;  %v82_v42 = vld [vmem:[%s3777_s0 + $0x110] sm:$0xff] }
  0x1d   :  { %2489 = vmatpush3.bf16.msra.mxu1 %v2748_v27  ;;  %v96_v27 = vpack.c.bf16 %v61_v25, %v54_v23  ;;  %v88_v40 = vld [vmem:[%s3777_s0 + $0x140] sm:$0xff]  ;;  %v2771_v51 = vld [vmem:[%s3780_s3 + $0x8] sm:$0xff]   ;;  %v2772_v52 = vld [vmem:[%s3780_s3 + $0x10] sm:$0xff]  }
  0x1e   :  { %2490 = vmatprep.subr.bf16.mxu1 %v2751_v30  ;;  %v67_v30 = vld [vmem:[%s3777_s0 + $0x98] sm:$0xff]  ;;  %v109_v45 = vpack.c.bf16 %v88_v40, %v81_v39  ;;  %v2775_v55 = vld [vmem:[%s3780_s3 + $0x28] sm:$0xff]   ;;  %v2776_v56 = vld [vmem:[%s3780_s3 + $0x30] sm:$0xff]  }
  0x1f   :  { %2457 = vmatpush3.bf16.msra.mxu0 %v2750_v29  ;;  %v59_v29 = vld [vmem:[%s3777_s0 + $0x58] sm:$0xff]  ;;  %v102_v35 = vpack.c.bf16 %v74_v31, %v67_v30  ;;  %v2780_v60 = vld [vmem:[%s3782_s5 + $0x10] sm:$0xff]  }
  0x20   :  { %2510 = vmatprep.subr.bf16.mxu0 %v2753_v38  ;;  %v103_v38 = vpack.c.bf16 %v75_v33, %v68_v32 }
  0x21   :  { %2491 = vmatpush3.bf16.msra.mxu1 %v2752_v34  ;;  %v94_v34 = vpack.c.bf16 %v59_v29, %v52_v28 }
  0x22   :  { %2589 = vmatprep.subr.bf16.mxu1 %v2976_v41  ;;  %553 = vmatmul.mubr.bf16.vlgmr.msra.gmra.mrb[0].mxu0 %v90_v37  ;;  %v73_v37 = vld [vmem:[%s3777_s0 + $0xc8] sm:$0xff] }
  0x23   :  { %2511 = vmatpush3.bf16.msra.mxu0 %v2754_v43  ;;  %560 = vmatprep.mubr.bf16.mxu0 %v98_v53  ;;  %v89_v43 = vld [vmem:[%s3777_s0 + $0x148] sm:$0xff]  ;;  %v101_v44 = vpack.c.bf16 %v73_v37, %v66_v36  ;;  %v2773_v53 = vld [vmem:[%s3780_s3 + $0x18] sm:$0xff]  }
  0x24   :  { %610 = vmatmul.mubr.bf16.vlgmr.msra.gmra.mrb[0].mxu1 %v92_v46  ;;  %2512 = vmatprep.subr.bf16.mxu0 %v2755_v47  ;;  %v80_v46 = vld [vmem:[%s3777_s0 + $0x100] sm:$0xff]  ;;  %v87_v47 = vld [vmem:[%s3777_s0 + $0x138] sm:$0xff] }
  0x25   :  { %2590 = vmatpush3.bf16.msra.mxu1 %v2761_v59  ;;  %617 = vmatprep.mubr.bf16.mxu1 %v100_v62  ;;  %v2779_v59 = vld [vmem:[%s3782_s5 + $0x8] sm:$0xff]   ;;  %v2254_v62 = vld [vmem:[%s3779_s2] ss:$0 sm:$0xff] }
  0x26   :  { %2603 = vmatprep.subr.bf16.mxu1 %v2976_v41 }
  0x27   :  { %2513 = vmatpush3.bf16.msra.mxu0 %v2756_v48  ;;  %v110_v48 = vpack.c.bf16 %v89_v43, %v82_v42 }
  0x28   :  { %2514 = vmatprep.subr.bf16.mxu0 %v2757_v49  ;;  %v108_v49 = vpack.c.bf16 %v87_v47, %v80_v46 }
  0x2a   :  { %561 = vmatmul.mubr.bf16.gmra.mrb[4].mxu0 %v97_v57  ;;  %v2777_v57 = vld [vmem:[%s3780_s3 + $0x38] sm:$0xff]  }
  0x2b   :  { %2515 = vmatpush3.bf16.msra.mxu0 %v2758_v50  ;;  %568 = vmatprep.mubr.bf16.mxu0 %v105_v6  ;;  %v2770_v50 = vld [vmem:[%s3780_s3] sm:$0xff]  }
  0x2c   :  { %2516 = vmatprep.subr.bf16.mxu0 %v2759_v54  ;;  %618 = vmatmul.mubr.bf16.gmra.mrb[4].mxu1 %v99_v1  ;;  %v2774_v54 = vld [vmem:[%s3780_s3 + $0x20] sm:$0xff]  }
  0x2d   :  { %625 = vmatprep.mubr.bf16.mxu1 %v107_v14 }
  0x2f   :  { %2517 = vmatpush3.bf16.msra.mxu0 %v2760_v58  ;;  %v2778_v58 = vld [vmem:[%s3782_s5] sm:$0xff]  }
  0x30   :  { %2518 = vmatprep.subr.bf16.mxu0 %v2762_v2 }
  0x32   :  { %569 = vmatmul.mubr.bf16.gmra.mrb[8].mxu0 %v104_v10 }
  0x33   :  { %2519 = vmatpush3.bf16.msra.mxu0 %v2763_v5  ;;  %666 = vmatprep.mubr.bf16.mxu0 %v95_v22 }
  0x34   :  { %2520 = vmatprep.subr.bf16.mxu0 %v2764_v9  ;;  %626 = vmatmul.mubr.bf16.gmra.mrb[8].mxu1 %v106_v17 }
  0x35   :  { %2591 = vmatprep.mubr.msk.bf16.mxu1 %vm2977_vm0, %v2976_v41 }
  0x37   :  { %2521 = vmatpush3.bf16.msra.mxu0 %v2765_v16 }
  0x38   :  { %2522 = vmatprep.subr.bf16.mxu0 %v2766_v18 }
  0x3b   :  { %2523 = vmatpush3.bf16.msra.mxu0 %v2767_v21 }
  0x3c   :  { %2524 = vmatprep.subr.bf16.mxu0 %v2768_v24  ;;  %2592 = vmatmul.mubr.msk.bf16.vlgmr.msra.gmra.mrb[12].mxu1 %vm510_vm1, %v96_v27 }
  0x3d   :  { %2595 = vmatprep.mubr.msk.bf16.mxu1 %vm2977_vm0, %v2976_v41  ;;  %2604 = vmatpush3.bf16.msra.mxu1 %v2770_v50 }
  0x3e   :  { %2605 = vmatprep.subr.bf16.mxu1 %v2976_v41 }
  0x3f   :  { %2525 = vmatpush3.bf16.msra.mxu0 %v2769_v26 }
  0x40   :  { %2631 = vmatprep.subr.bf16.mxu0 %v2976_v41 }
  0x41   :  { %2606 = vmatpush3.bf16.msra.mxu1 %v2771_v51 }
  0x42   :  { %667 = vmatmul.mubr.bf16.vlgmr.msra.gmra.mrb[12].mxu0 %v94_v34  ;;  %2607 = vmatprep.subr.bf16.mxu1 %v2976_v41 }
  0x43   :  { %674 = vmatprep.mubr.bf16.mxu0 %v102_v35  ;;  %2632 = vmatpush3.bf16.msra.mxu0 %v2778_v58 }
  0x44   :  { %2596 = vmatmul.mubr.msk.bf16.gmra.mrb[16].mxu1 %vm510_vm1, %v103_v38  ;;  %2633 = vmatprep.subr.bf16.mxu0 %v2976_v41 }
  0x45   :  { %2599 = vmatprep.mubr.msk.bf16.mxu1 %vm2977_vm0, %v2976_v41  ;;  %2608 = vmatpush3.bf16.msra.mxu1 %v2772_v52 }
  0x46   :  { %2609 = vmatprep.subr.bf16.mxu1 %v2976_v41 }
  0x47   :  { %2634 = vmatpush3.bf16.msra.mxu0 %v2779_v59 }
  0x48   :  { %2635 = vmatprep.subr.bf16.mxu0 %v2976_v41 }
  0x49   :  { %2610 = vmatpush3.bf16.msra.mxu1 %v2773_v53 }
  0x4a   :  { %675 = vmatmul.mubr.bf16.gmra.mrb[16].mxu0 %v101_v44  ;;  %2611 = vmatprep.subr.bf16.mxu1 %v2976_v41 }
  0x4b   :  { %682 = vmatprep.mubr.bf16.mxu0 %v109_v45  ;;  %2636 = vmatpush3.bf16.msra.mxu0 %v2780_v60 }
  0x4c   :  { %2600 = vmatmul.mubr.msk.bf16.gmra.mrb[20].mxu1 %vm510_vm1, %v110_v48  ;;  %2637 = vmatprep.subr.bf16.mxu0 %v2976_v41 }
  0x4d   :  { %2619 = vmatprep.mubr.msk.bf16.mxu1 %vm2977_vm0, %v2976_v41  ;;  %2612 = vmatpush3.bf16.msra.mxu1 %v2774_v54 }
  0x4e   :  { %2613 = vmatprep.subr.bf16.mxu1 %v2976_v41 }
  0x51   :  { %2614 = vmatpush3.bf16.msra.mxu1 %v2775_v55 }
  0x52   :  { %683 = vmatmul.mubr.bf16.gmra.mrb[20].mxu0 %v108_v49  ;;  %2615 = vmatprep.subr.bf16.mxu1 %v2976_v41 }
  0x53   :  { %2639 = vmatprep.mubr.msk.bf16.mxu0 %vm2977_vm0, %v2976_v41 }
  0x55   :  { %2616 = vmatpush3.bf16.msra.mxu1 %v2776_v56 }
  0x56   :  { %2617 = vmatprep.subr.bf16.mxu1 %v2976_v41 }
  0x59   :  { %2618 = vmatpush3.bf16.msra.mxu1 %v2777_v57 }
  0x5a   :  { %2667 = vmatprep.subr.bf16.mxu1 %v2976_v41 }
  0xf5   :  { %v2458_v61 = vpop.f32.mrb[0].mxu0 }
  0xf6   :  { %v2459_v63 = vpop.f32.mrb[1].mxu0 }
  0xf7   :  { %v2460_v0 = vadd.f32 %v2459_v63, %v2458_v61  ;;  %v2461_v1 = vpop.f32.mrb[2].mxu0  ;;  %v2492_v2 = vpop.f32.mrb[0].mxu1 }
  0xf8   :  { %v2462_v3 = vpop.f32.mrb[3].mxu0  ;;  %v2493_v6 = vpop.f32.mrb[1].mxu1 }
  0xf9   :  { %v555_v4 = vadd.f32 %v2460_v0, %v2254_v62  ;;  %v2463_v5 = vadd.f32 %v2462_v3, %v2461_v1  ;;  %v2494_v7 = vadd.f32 %v2493_v6, %v2492_v2  ;;  %v2495_v8 = vpop.f32.mrb[2].mxu1 }
  0xfa   :  { %v2496_v10 = vpop.f32.mrb[3].mxu1 }
  0xfb   :  { %v558_v9 = vadd.f32 %v2463_v5, %v2254_v62  ;;  %v612_v11 = vadd.f32 %v2494_v7, %v555_v4  ;;  %v2497_v12 = vadd.f32 %v2496_v10, %v2495_v8 }
  0xfd   :  { %v615_v13 = vadd.f32 %v2497_v12, %v558_v9  ;;  %v2464_v14 = vpop.f32.mrb[4].mxu0 }
  0xfe   :  { %v2465_v15 = vpop.f32.mrb[5].mxu0 }
  0xff   :  { %v2466_v16 = vadd.f32 %v2465_v15, %v2464_v14  ;;  %v2467_v17 = vpop.f32.mrb[6].mxu0  ;;  %v2498_v18 = vpop.f32.mrb[4].mxu1 }
 0x100   :  { %v2468_v19 = vpop.f32.mrb[7].mxu0  ;;  %v2499_v20 = vpop.f32.mrb[5].mxu1 }
 0x101   :  { %v563_v21 = vadd.f32 %v2466_v16, %v2254_v62  ;;  %v2469_v22 = vadd.f32 %v2468_v19, %v2467_v17  ;;  %v2500_v23 = vadd.f32 %v2499_v20, %v2498_v18  ;;  %v2501_v24 = vpop.f32.mrb[6].mxu1 }
 0x102   :  { %v2502_v25 = vpop.f32.mrb[7].mxu1 }
 0x103   :  { %v566_v26 = vadd.f32 %v2469_v22, %v2254_v62  ;;  %v620_v27 = vadd.f32 %v2500_v23, %v563_v21  ;;  %v2503_v28 = vadd.f32 %v2502_v25, %v2501_v24 }
 0x105   :  { %v623_v29 = vadd.f32 %v2503_v28, %v566_v26  ;;  %v2470_v30 = vpop.f32.mrb[8].mxu0 }
 0x106   :  { %v2471_v31 = vpop.f32.mrb[9].mxu0 }
 0x107   :  { %v2472_v32 = vadd.f32 %v2471_v31, %v2470_v30  ;;  %v2473_v33 = vpop.f32.mrb[10].mxu0  ;;  %v2504_v34 = vpop.f32.mrb[8].mxu1 }
 0x108   :  { %v2474_v35 = vpop.f32.mrb[11].mxu0  ;;  %v2505_v36 = vpop.f32.mrb[9].mxu1 }
 0x109   :  { %v571_v37 = vadd.f32 %v2472_v32, %v2254_v62  ;;  %v2475_v38 = vadd.f32 %v2474_v35, %v2473_v33  ;;  %v2506_v39 = vadd.f32 %v2505_v36, %v2504_v34  ;;  %v2507_v40 = vpop.f32.mrb[10].mxu1  ;;  %v2781_v34 = vld [vmem:[%s3782_s5 + $0x18] sm:$0xff]   ;;  %v2307_v35 = vld [vmem:[%s3781_s4] ss:$0 sm:$0xff] }
 0x10a   :  { %v2508_v42 = vpop.f32.mrb[11].mxu1  ;;  %2638 = vmatpush3.bf16.msra.mxu0 %v2781_v34  ;;  %v2800_v34 = vld [vmem:[%s3788_s11 + $0x70] ss:$28 sps:$4 sm:$0xff]  }
 0x10b   :  { %v574_v43 = vadd.f32 %v2475_v38, %v2254_v62  ;;  %v628_v44 = vadd.f32 %v2506_v39, %v571_v37  ;;  %v2509_v45 = vadd.f32 %v2508_v42, %v2507_v40  ;;  %2651 = vmatprep.subr.bf16.mxu0 %v2976_v41 }
 0x10d   :  { %v631_v46 = vadd.f32 %v2509_v45, %v574_v43  ;;  %v2782_v45 = vld [vmem:[%s3784_s7] sm:$0xff]  }
 0x10f   :  { %v725_v47 = vpop.f32.mrb[12].mxu1 }
 0x110   :  { %v2593_v48 = vpop.f32.mrb[13].mxu1 }
 0x111   :  { %v728_v49 = vpop.f32.mrb[14].mxu1 }
 0x112   :  { %v2594_v50 = vpop.f32.mrb[15].mxu1 }
 0x115   :  { %v2526_v51 = vpop.f32.mrb[12].mxu0 }
 0x116   :  { %v2527_v52 = vpop.f32.mrb[13].mxu0 }
 0x117   :  { %v2528_v53 = vadd.f32 %v2527_v52, %v2526_v51  ;;  %v2529_v54 = vpop.f32.mrb[14].mxu0  ;;  %v733_v58 = vpop.f32.mrb[16].mxu1  ;;  %v2783_v51 = vld [vmem:[%s3784_s7 + $0x8] sm:$0xff]  }
 0x118   :  { %v2530_v55 = vpop.f32.mrb[15].mxu0  ;;  %v2597_v59 = vpop.f32.mrb[17].mxu1 }
 0x119   :  { %v669_v56 = vadd.f32 %v2528_v53, %v612_v11  ;;  %v2531_v57 = vadd.f32 %v2530_v55, %v2529_v54  ;;  %v736_v63 = vpop.f32.mrb[18].mxu1 }
 0x11a   :  { %v2598_v62 = vpop.f32.mrb[19].mxu1 }
 0x11b   :  { %v726_v60 = vadd.f32 %v725_v47, %v669_v56  ;;  %v672_v61 = vadd.f32 %v2531_v57, %v615_v13 }
 0x11d   :  { %v729_v0 = vadd.f32 %v728_v49, %v672_v61  ;;  %v2532_v1 = vpop.f32.mrb[16].mxu0  ;;  %v748_v3 = vmax.f32 %v726_v60, 0.0 }
 0x11e   :  { %v2533_v2 = vpop.f32.mrb[17].mxu0 }
 0x11f   :  { %v749_v4 = vmax.f32 %v729_v0, 0.0  ;;  %v2534_v5 = vadd.f32 %v2533_v2, %v2532_v1  ;;  %v2535_v6 = vpop.f32.mrb[18].mxu0  ;;  %v741_v12 = vpop.f32.mrb[20].mxu1  ;;  %v2784_v2 = vld [vmem:[%s3786_s9] sm:$0xff]  }
 0x120   :  { %v2536_v7 = vpop.f32.mrb[19].mxu0  ;;  %v2601_v11 = vpop.f32.mrb[21].mxu1 }
 0x121   :  { %v754_v8 = vpack.c.bf16 %v749_v4, %v748_v3  ;;  %v2537_v9 = vadd.f32 %v2536_v7, %v2535_v6  ;;  %v677_v10 = vadd.f32 %v2534_v5, %v620_v27  ;;  %v744_v16 = vpop.f32.mrb[22].mxu1  ;;  %v2785_v3 = vld [vmem:[%s3786_s9 + $0x8] sm:$0xff]   ;;  %v2786_v4 = vld [vmem:[%s3786_s9 + $0x10] sm:$0xff]   ;;  %v2316_v5 = vld [vmem:[%s3783_s6] ss:$0 sm:$0xff] }
 0x122   :  { %v2602_v13 = vpop.f32.mrb[23].mxu1 }
 0x123   :  { %v734_v14 = vadd.f32 %v733_v58, %v677_v10  ;;  %2620 = vmatmul.mubr.bf16.vlgmr.msra.gmra.mrb[24].mxu1 %v754_v8  ;;  %v680_v15 = vadd.f32 %v2537_v9, %v623_v29 }
 0x124   :  { %2623 = vmatprep.mubr.msk.bf16.mxu1 %vm2977_vm0, %v2976_v41  ;;  %2668 = vmatpush3.bf16.msra.mxu1 %v2784_v2  ;;  %v2811_v2 = vld [vmem:[%s3788_s11 + $0xb4] ss:$28 sps:$4 sm:$0xff]  }
 0x125   :  { %v737_v17 = vadd.f32 %v736_v63, %v680_v15  ;;  %v2538_v18 = vpop.f32.mrb[20].mxu0  ;;  %v750_v20 = vmax.f32 %v734_v14, 0.0  ;;  %2669 = vmatprep.subr.bf16.mxu1 %v2976_v41 }
 0x126   :  { %v2539_v19 = vpop.f32.mrb[21].mxu0 }
 0x127   :  { %v751_v21 = vmax.f32 %v737_v17, 0.0  ;;  %v2540_v22 = vadd.f32 %v2539_v19, %v2538_v18  ;;  %v2541_v23 = vpop.f32.mrb[22].mxu0 }
 0x128   :  { %v2542_v24 = vpop.f32.mrb[23].mxu0  ;;  %2670 = vmatpush3.bf16.msra.mxu1 %v2785_v3 }
 0x129   :  { %v755_v25 = vpack.c.bf16 %v751_v21, %v750_v20  ;;  %v2543_v26 = vadd.f32 %v2542_v24, %v2541_v23  ;;  %v685_v27 = vadd.f32 %v2540_v22, %v628_v44  ;;  %2671 = vmatprep.subr.bf16.mxu1 %v2976_v41 }
 0x12b   :  { %v742_v28 = vadd.f32 %v741_v12, %v685_v27  ;;  %2624 = vmatmul.mubr.bf16.gmra.mrb[28].mxu1 %v755_v25  ;;  %v688_v30 = vadd.f32 %v2543_v26, %v631_v46  ;;  %v2787_v27 = vld [vmem:[%s3786_s9 + $0x18] sm:$0xff]  }
 0x12c   :  { %2627 = vmatprep.mubr.msk.bf16.mxu1 %vm2977_vm0, %v2976_v41  ;;  %2672 = vmatpush3.bf16.msra.mxu1 %v2786_v4 }
 0x12d   :  { %v745_v29 = vadd.f32 %v744_v16, %v688_v30  ;;  %v752_v31 = vmax.f32 %v742_v28, 0.0  ;;  %2673 = vmatprep.subr.bf16.mxu1 %v2976_v41  ;;  %v2788_v28 = vld [vmem:[%s3788_s11] ss:$28 sps:$4 sm:$0xff]  }
 0x12e   :  { %v2790_v30 = vld [vmem:[%s3788_s11 + $0x4] ss:$28 sps:$4 sm:$0xff]  }
 0x12f   :  { %v753_v32 = vmax.f32 %v745_v29, 0.0  ;;  %v2793_v29 = vld [vmem:[%s3788_s11 + $0xc] ss:$28 sps:$4 sm:$0xff]  }
 0x130   :  { %2674 = vmatpush3.bf16.msra.mxu1 %v2787_v27  ;;  %v2330_v27 = vld [vmem:[%s3787_s10] ss:$0 sm:$0xff] }
 0x131   :  { %v756_v33 = vpack.c.bf16 %v753_v32, %v752_v31  ;;  %v2796_v31 = vld [vmem:[%s3788_s11 + $0x3c] ss:$28 sps:$4 sm:$0xff]   ;;  %1674 = vmatprep.subr.bf16.mxu1 %v2793_v29 }
 0x132   :  { %v2794_v32 = vld [vmem:[%s3788_s11 + $0x38] ss:$28 sps:$4 sm:$0xff]  }
 0x133   :  { %2628 = vmatmul.mubr.bf16.gmra.mrb[32].mxu1 %v756_v33  ;;  %v2802_v33 = vld [vmem:[%s3788_s11 + $0x74] ss:$28 sps:$4 sm:$0xff]  }
 0x134   :  { %2675 = vmatprep.mubr.msk.bf16.mxu1 %vm2977_vm0, %v2976_v41 }
 0x1f6   :  { %v862_v36 = vpop.f32.mrb[24].mxu1 }
 0x1f7   :  { %v863_v37 = vadd.f32 %v2307_v35, %v862_v36  ;;  %v2621_v38 = vpop.f32.mrb[25].mxu1  ;;  %v2806_v36 = vld [vmem:[%s3788_s11 + $0xa8] ss:$28 sps:$4 sm:$0xff]  }
 0x1f8   :  { %v865_v39 = vpop.f32.mrb[26].mxu1  ;;  %v2812_v38 = vld [vmem:[%s3788_s11 + $0xe0] ss:$28 sps:$4 sm:$0xff]  }
 0x1f9   :  { %v866_v40 = vadd.f32 %v2307_v35, %v865_v39  ;;  %v2622_v42 = vpop.f32.mrb[27].mxu1  ;;  %v885_v43 = vmax.f32 %v863_v37, 0.0  ;;  %v2814_v37 = vld [vmem:[%s3788_s11 + $0xe4] ss:$28 sps:$4 sm:$0xff]   ;;  %v2820_v39 = vld [vmem:[%s3788_s11 + $0x11c] ss:$28 sps:$4 sm:$0xff]  }
 0x1fa   :  { %v2324_v42 = vld [vmem:[%s3785_s8] ss:$0 sm:$0xff] }
 0x1fb   :  { %v886_v44 = vmax.f32 %v866_v40, 0.0  ;;  %v2818_v40 = vld [vmem:[%s3788_s11 + $0x118] ss:$28 sps:$4 sm:$0xff]  }
 0x1fd   :  { %v891_v46 = vpack.c.bf16 %v886_v44, %v885_v43 }
 0x1fe   :  { %v870_v47 = vpop.f32.mrb[28].mxu1 }
 0x1ff   :  { %v871_v48 = vadd.f32 %v2307_v35, %v870_v47  ;;  %v2625_v49 = vpop.f32.mrb[29].mxu1  ;;  %2640 = vmatmul.mubr.msk.bf16.vlgmr.msra.gmra.mrb[24].mxu0 %vm933_vm2, %v891_v46 }
 0x200   :  { %v873_v50 = vpop.f32.mrb[30].mxu1  ;;  %2643 = vmatprep.mubr.msk.bf16.mxu0 %vm2977_vm0, %v2976_v41  ;;  %2652 = vmatpush3.bf16.msra.mxu0 %v2782_v45 }
 0x201   :  { %v874_v52 = vadd.f32 %v2307_v35, %v873_v50  ;;  %v2626_v53 = vpop.f32.mrb[31].mxu1  ;;  %2653 = vmatprep.subr.bf16.mxu0 %v2976_v41  ;;  %v887_v54 = vmax.f32 %v871_v48, 0.0 }
 0x202   :  { %v2799_v53 = vld [vmem:[%s3788_s11 + $0x44] ss:$28 sps:$4 sm:$0xff]  }
 0x203   :  { %v888_v55 = vmax.f32 %v874_v52, 0.0 }
 0x204   :  { %2654 = vmatpush3.bf16.msra.mxu0 %v2783_v51  ;;  %v2791_v51 = vld [vmem:[%s3788_s11 + $0x8] ss:$28 sps:$4 sm:$0xff]  }
 0x205   :  { %v892_v56 = vpack.c.bf16 %v888_v55, %v887_v54  ;;  %1611 = vmatprep.subr.bf16.mxu0 %v2790_v30 }
 0x206   :  { %v878_v57 = vpop.f32.mrb[32].mxu1 }
 0x207   :  { %v879_v58 = vadd.f32 %v2307_v35, %v878_v57  ;;  %v2629_v59 = vpop.f32.mrb[33].mxu1  ;;  %2644 = vmatmul.mubr.msk.bf16.gmra.mrb[28].mxu0 %vm933_vm2, %v892_v56 }
 0x208   :  { %v881_v60 = vpop.f32.mrb[34].mxu1  ;;  %2647 = vmatprep.mubr.msk.bf16.mxu0 %vm2977_vm0, %v2976_v41 }
 0x209   :  { %v882_v61 = vadd.f32 %v2307_v35, %v881_v60  ;;  %v2630_v63 = vpop.f32.mrb[35].mxu1  ;;  %v889_v62 = vmax.f32 %v879_v58, 0.0  ;;  %v2808_v35 = vld [vmem:[%s3788_s11 + $0xac] ss:$28 sps:$4 sm:$0xff]   ;;  %v2797_v58 = vld [vmem:[%s3788_s11 + $0x40] ss:$28 sps:$4 sm:$0xff]  }
 0x20b   :  { %v890_v0 = vmax.f32 %v882_v61, 0.0  ;;  %v2805_v61 = vld [vmem:[%s3788_s11 + $0x7c] ss:$28 sps:$4 sm:$0xff]  }
 0x20d   :  { %v893_v1 = vpack.c.bf16 %v890_v0, %v889_v62  ;;  %v2803_v0 = vld [vmem:[%s3788_s11 + $0x78] ss:$28 sps:$4 sm:$0xff]  }
 0x20f   :  { %2648 = vmatmul.mubr.msk.bf16.gmra.mrb[32].mxu0 %vm933_vm2, %v893_v1 }
 0x210   :  { %2655 = vmatprep.mubr.msk.bf16.mxu0 %vm2977_vm0, %v2976_v41 }
 0x2d2   :  { %v977_v6 = vpop.f32.mrb[24].mxu0 }
 0x2d3   :  { %v978_v7 = vadd.f32 %v2316_v5, %v977_v6  ;;  %v2641_v8 = vpop.f32.mrb[25].mxu0 }
 0x2d4   :  { %v980_v9 = vpop.f32.mrb[26].mxu0 }
 0x2d5   :  { %1001 = vst.msk [vmem:[#allocation4] sm:$0xff] %vm1000_vm3, %v978_v7  ;;  %v981_v10 = vadd.f32 %v2316_v5, %v980_v9  ;;  %v2642_v12 = vpop.f32.mrb[27].mxu0 }
 0x2d7   :  { %1002 = vst.msk [vmem:[#allocation4 + $0x8] sm:$0xff] %vm1000_vm3, %v981_v10  ;;  %v1007_v11 = vpack.c.bf16 %v981_v10, %v978_v7  ;;  %v2809_v7 = vld [vmem:[%s3788_s11 + $0xb0] ss:$28 sps:$4 sm:$0xff]  }
 0x2d8   :  { %v2817_v10 = vld [vmem:[%s3788_s11 + $0xec] ss:$28 sps:$4 sm:$0xff]  }
 0x2d9   :  { %2656 = vmatmul.mubr.msk.bf16.vlgmr.msra.gmra.mrb[36].mxu0 %vm1000_vm3, %v1007_v11 }
 0x2da   :  { %v985_v14 = vpop.f32.mrb[28].mxu0  ;;  %2659 = vmatprep.mubr.msk.bf16.mxu0 %vm2977_vm0, %v2976_v41  ;;  %1612 = vmatpush1.bf16.msra.mxu0 %v2788_v28 }
 0x2db   :  { %v986_v15 = vadd.f32 %v2316_v5, %v985_v14  ;;  %v2645_v16 = vpop.f32.mrb[29].mxu0  ;;  %1613 = vmatprep.subr.bf16.mxu0 %v2796_v31  ;;  %v2815_v14 = vld [vmem:[%s3788_s11 + $0xe8] ss:$28 sps:$4 sm:$0xff]  }
 0x2dc   :  { %v988_v13 = vpop.f32.mrb[30].mxu0  ;;  %v2823_v16 = vld [vmem:[%s3788_s11 + $0x124] ss:$28 sps:$4 sm:$0xff]  }
 0x2dd   :  { %1003 = vst.msk [vmem:[#allocation4 + $0x10] sm:$0xff] %vm1000_vm3, %v986_v15  ;;  %v989_v17 = vadd.f32 %v2316_v5, %v988_v13  ;;  %v2646_v18 = vpop.f32.mrb[31].mxu0  ;;  %v2821_v13 = vld [vmem:[%s3788_s11 + $0x120] ss:$28 sps:$4 sm:$0xff]  }
 0x2de   :  { %1614 = vmatpush1.bf16.msra.mxu0 %v2794_v32  ;;  %v2829_v18 = vld [vmem:[%s3788_s11 + $0x15c] ss:$28 sps:$4 sm:$0xff]  }
 0x2df   :  { %1004 = vst.msk [vmem:[#allocation4 + $0x18] sm:$0xff] %vm1000_vm3, %v989_v17  ;;  %v1008_v19 = vpack.c.bf16 %v989_v17, %v986_v15  ;;  %1615 = vmatprep.subr.bf16.mxu0 %v2802_v33  ;;  %v2826_v17 = vld [vmem:[%s3788_s11 + $0x154] ss:$28 sps:$4 sm:$0xff]  }
 0x2e1   :  { %2660 = vmatmul.mubr.msk.bf16.gmra.mrb[40].mxu0 %vm1000_vm3, %v1008_v19  ;;  %v2824_v19 = vld [vmem:[%s3788_s11 + $0x150] ss:$28 sps:$4 sm:$0xff]  }
 0x2e2   :  { %v993_v20 = vpop.f32.mrb[32].mxu0  ;;  %2663 = vmatprep.mubr.msk.bf16.mxu0 %vm2977_vm0, %v2976_v41  ;;  %1616 = vmatpush1.bf16.msra.mxu0 %v2800_v34 }
 0x2e3   :  { %v994_v21 = vadd.f32 %v2316_v5, %v993_v20  ;;  %v2649_v22 = vpop.f32.mrb[33].mxu0  ;;  %1617 = vmatprep.subr.bf16.mxu0 %v2808_v35  ;;  %v2827_v20 = vld [vmem:[%s3788_s11 + $0x158] ss:$28 sps:$4 sm:$0xff]  }
 0x2e4   :  { %v996_v23 = vpop.f32.mrb[34].mxu0  ;;  %v2835_v22 = vld [vmem:[%s3788_s11 + $0x194] ss:$28 sps:$4 sm:$0xff]  }
 0x2e5   :  { %1005 = vst.msk [vmem:[#allocation4 + $0x20] sm:$0xff] %vm1000_vm3, %v994_v21  ;;  %v997_v24 = vadd.f32 %v2316_v5, %v996_v23  ;;  %v2650_v25 = vpop.f32.mrb[35].mxu0  ;;  %v2830_v23 = vld [vmem:[%s3788_s11 + $0x188] ss:$28 sps:$4 sm:$0xff]  }
 0x2e6   :  { %1618 = vmatpush1.bf16.msra.mxu0 %v2806_v36  ;;  %v2838_v25 = vld [vmem:[%s3788_s11 + $0x14] ss:$28 sps:$4 sm:$0xff]  }
 0x2e7   :  { %v1009_v26 = vpack.c.bf16 %v997_v24, %v994_v21  ;;  %1619 = vmatprep.subr.bf16.mxu0 %v2814_v37  ;;  %v2832_v21 = vld [vmem:[%s3788_s11 + $0x18c] ss:$28 sps:$4 sm:$0xff]   ;;  %v2839_v37 = vld [vmem:[%s3788_s11 + $0x18] ss:$28 sps:$4 sm:$0xff]  }
 0x2e8   :  { %v2833_v24 = vld [vmem:[%s3788_s11 + $0x190] ss:$28 sps:$4 sm:$0xff]  }
 0x2e9   :  { %2664 = vmatmul.mubr.msk.bf16.gmra.mrb[44].mxu0 %vm1000_vm3, %v1009_v26  ;;  %v2978_v26 = vmov 0   ;;  %v2836_v36 = vld [vmem:[%s3788_s11 + $0x10] ss:$28 sps:$4 sm:$0xff]  }
 0x2ea   :  { %1620 = vmatpush1.bf16.msra.mxu0 %v2812_v38  ;;  %1643 = vmatprep.mubr.bf16.mxu0 %v2978_v26 }
 0x2eb   :  { %1621 = vmatprep.subr.bf16.mxu0 %v2820_v39  ;;  %v2842_v39 = vld [vmem:[%s3788_s11 + $0x4c] ss:$28 sps:$4 sm:$0xff]  }
 0x2ee   :  { %1622 = vmatpush1.bf16.msra.mxu0 %v2818_v40 }
 0x2ef   :  { %1623 = vmatprep.subr.bf16.mxu0 %v2826_v17 }
 0x2f2   :  { %1624 = vmatpush1.bf16.msra.mxu0 %v2824_v19  ;;  %v3669_v19 = vld [vmem:[%s3789_s12] sm:$0x7f] }
 0x2f3   :  { %1625 = vmatprep.subr.bf16.mxu0 %v2832_v21 }
 0x2f6   :  { %1626 = vmatpush1.bf16.msra.mxu0 %v2830_v23 }
 0x2f7   :  { %1737 = vmatprep.subr.bf16.mxu0 %v2838_v25 }
 0x3ac   :  { %v1076_v43 = vpop.f32.mrb[36].mxu0 }
 0x3ad   :  { %v1077_v44 = vadd.f32 %v2324_v42, %v1076_v43  ;;  %v2657_v45 = vpop.f32.mrb[37].mxu0 }
 0x3ae   :  { %v1079_v46 = vpop.f32.mrb[38].mxu0  ;;  %v2840_v45 = vld [vmem:[%s3788_s11 + $0x48] ss:$28 sps:$4 sm:$0xff]  }
 0x3af   :  { %v1080_v47 = vadd.f32 %v2324_v42, %v1079_v46  ;;  %v2658_v48 = vpop.f32.mrb[39].mxu0  ;;  %v1099_v49 = vmax.f32 %v1077_v44, 0.0  ;;  %v2843_v46 = vld [vmem:[%s3788_s11 + $0x50] ss:$28 sps:$4 sm:$0xff]  }
 0x3b1   :  { %v1100_v50 = vmax.f32 %v1080_v47, 0.0 }
 0x3b3   :  { %v1105_v52 = vpack.c.bf16 %v1100_v50, %v1099_v49  ;;  %v2846_v49 = vld [vmem:[%s3788_s11 + $0x84] ss:$28 sps:$4 sm:$0xff]  }
 0x3b4   :  { %v1084_v54 = vpop.f32.mrb[40].mxu0 }
 0x3b5   :  { %v1085_v55 = vadd.f32 %v2324_v42, %v1084_v54  ;;  %v2661_v56 = vpop.f32.mrb[41].mxu0  ;;  %2676 = vmatmul.mubr.msk.bf16.vlgmr.msra.gmra.mrb[36].mxu1 %vm933_vm2, %v1105_v52  ;;  %v2844_v52 = vld [vmem:[%s3788_s11 + $0x80] ss:$28 sps:$4 sm:$0xff]  }
 0x3b6   :  { %v1087_v57 = vpop.f32.mrb[42].mxu0  ;;  %2679 = vmatprep.mubr.msk.bf16.mxu1 %vm2977_vm0, %v2976_v41  ;;  %1675 = vmatpush1.bf16.msra.mxu1 %v2791_v51 }
 0x3b7   :  { %v1088_v59 = vadd.f32 %v2324_v42, %v1087_v57  ;;  %v2662_v60 = vpop.f32.mrb[43].mxu0  ;;  %1676 = vmatprep.subr.bf16.mxu1 %v2799_v53  ;;  %v1101_v63 = vmax.f32 %v1085_v55, 0.0  ;;  %v2847_v53 = vld [vmem:[%s3788_s11 + $0x88] ss:$28 sps:$4 sm:$0xff]   ;;  %v2850_v55 = vld [vmem:[%s3788_s11 + $0xbc] ss:$28 sps:$4 sm:$0xff]  }
 0x3b8   :  { %v2848_v60 = vld [vmem:[%s3788_s11 + $0xb8] ss:$28 sps:$4 sm:$0xff]  }
 0x3b9   :  { %v1102_v62 = vmax.f32 %v1088_v59, 0.0 }
 0x3ba   :  { %1677 = vmatpush1.bf16.msra.mxu1 %v2797_v58 }
 0x3bb   :  { %v1106_v1 = vpack.c.bf16 %v1102_v62, %v1101_v63  ;;  %1678 = vmatprep.subr.bf16.mxu1 %v2805_v61  ;;  %v2851_v61 = vld [vmem:[%s3788_s11 + $0xc0] ss:$28 sps:$4 sm:$0xff]  }
 0x3bc   :  { %v1092_v3 = vpop.f32.mrb[44].mxu0 }
 0x3bd   :  { %v1093_v4 = vadd.f32 %v2324_v42, %v1092_v3  ;;  %v2665_v5 = vpop.f32.mrb[45].mxu0  ;;  %2680 = vmatmul.mubr.msk.bf16.gmra.mrb[40].mxu1 %vm933_vm2, %v1106_v1  ;;  %v2852_v3 = vld [vmem:[%s3788_s11 + $0xf0] ss:$28 sps:$4 sm:$0xff]  }
 0x3be   :  { %v1095_v6 = vpop.f32.mrb[46].mxu0  ;;  %2683 = vmatprep.mubr.msk.bf16.mxu1 %vm2977_vm0, %v2976_v41  ;;  %1679 = vmatpush1.bf16.msra.mxu1 %v2803_v0  ;;  %v2854_v0 = vld [vmem:[%s3788_s11 + $0xf4] ss:$28 sps:$4 sm:$0xff]  }
 0x3bf   :  { %v1096_v8 = vadd.f32 %v2324_v42, %v1095_v6  ;;  %v2666_v9 = vpop.f32.mrb[47].mxu0  ;;  %1680 = vmatprep.subr.bf16.mxu1 %v2811_v2  ;;  %v1103_v12 = vmax.f32 %v1093_v4, 0.0  ;;  %v2855_v4 = vld [vmem:[%s3788_s11 + $0xf8] ss:$28 sps:$4 sm:$0xff]   ;;  %v2858_v6 = vld [vmem:[%s3788_s11 + $0x12c] ss:$28 sps:$4 sm:$0xff]  }
 0x3c0   :  { %v2862_v9 = vld [vmem:[%s3788_s11 + $0x164] ss:$28 sps:$4 sm:$0xff]  }
 0x3c1   :  { %v1104_v11 = vmax.f32 %v1096_v8, 0.0  ;;  %v2859_v8 = vld [vmem:[%s3788_s11 + $0x130] ss:$28 sps:$4 sm:$0xff]  }
 0x3c2   :  { %1681 = vmatpush1.bf16.msra.mxu1 %v2809_v7  ;;  %v2856_v7 = vld [vmem:[%s3788_s11 + $0x128] ss:$28 sps:$4 sm:$0xff]  }
 0x3c3   :  { %v1107_v15 = vpack.c.bf16 %v1104_v11, %v1103_v12  ;;  %1682 = vmatprep.subr.bf16.mxu1 %v2817_v10  ;;  %v2860_v10 = vld [vmem:[%s3788_s11 + $0x160] ss:$28 sps:$4 sm:$0xff]   ;;  %v2863_v12 = vld [vmem:[%s3788_s11 + $0x168] ss:$28 sps:$4 sm:$0xff]  }
 0x3c4   :  { %v2866_v11 = vld [vmem:[%s3788_s11 + $0x19c] ss:$28 sps:$4 sm:$0xff]  }
 0x3c5   :  { %2684 = vmatmul.mubr.msk.bf16.gmra.mrb[44].mxu1 %vm933_vm2, %v1107_v15  ;;  %v2867_v15 = vld [vmem:[%s3788_s11 + $0x1a0] ss:$28 sps:$4 sm:$0xff]  }
 0x3c6   :  { %1683 = vmatpush1.bf16.msra.mxu1 %v2815_v14  ;;  %1706 = vmatprep.mubr.bf16.mxu1 %v2978_v26  ;;  %v2864_v14 = vld [vmem:[%s3788_s11 + $0x198] ss:$28 sps:$4 sm:$0xff]  }
 0x3c7   :  { %1684 = vmatprep.subr.bf16.mxu1 %v2823_v16  ;;  %v1288_v16 = vlaneseq }
 0x3ca   :  { %1685 = vmatpush1.bf16.msra.mxu1 %v2821_v13  ;;  %v3662_v13 = vshrl.u32 %v1288_v16, 7 }
 0x3cb   :  { %1686 = vmatprep.subr.bf16.mxu1 %v2829_v18 }
 0x3cc   :  { %v1290_v17 = vsub.s32 0, %v3662_v13  ;;  %v1298_v18 = vsub.s32 2, %v3662_v13  ;;  %v1302_v21 = vsub.s32 3, %v3662_v13 }
 0x3ce   :  { %1687 = vmatpush1.bf16.msra.mxu1 %v2827_v20  ;;  %v1294_v20 = vsub.s32 1, %v3662_v13 }
 0x3cf   :  { %1688 = vmatprep.subr.bf16.mxu1 %v2835_v22  ;;  %v3677_v22 = vrot.slane %v3669_v19, %v1298_v18 }
 0x3d0   :  { %v3680_v23 = vrot.slane %v3669_v19, %v1294_v20 }
 0x3d2   :  { %1689 = vmatpush1.bf16.msra.mxu1 %v2833_v24  ;;  %v3683_v24 = vrot.slane %v3669_v19, %v1302_v21 }
 0x3d3   :  { %2687 = vmatprep.subr.bf16.mxu1 %v2976_v41 }
 0x488   :  { %v1190_v28 = vpop.f32.mrb[36].mxu1 }
 0x489   :  { %v1191_v30 = vadd.f32 %v2330_v27, %v1190_v28  ;;  %v2677_v29 = vpop.f32.mrb[37].mxu1 }
 0x48a   :  { %v1193_v31 = vpop.f32.mrb[38].mxu1 }
 0x48b   :  { %v1194_v32 = vadd.f32 %v2330_v27, %v1193_v31  ;;  %v2678_v33 = vpop.f32.mrb[39].mxu1  ;;  %v1213_v34 = vmax.f32 %v1191_v30, 0.0 }
 0x48d   :  { %v1214_v35 = vmax.f32 %v1194_v32, 0.0 }
 0x48f   :  { %v3573_v38 = vpack.c.bf16 %v1214_v35, %v1213_v34 }
 0x490   :  { %v1198_v40 = vpop.f32.mrb[40].mxu1 }
 0x491   :  { %v1199_v42 = vadd.f32 %v2330_v27, %v1198_v40  ;;  %v2681_v43 = vpop.f32.mrb[41].mxu1  ;;  %1644 = vmatmul.mubr.bf16.vlgmr.msra.gmra.mrb[48].mxu0 %v3573_v38  ;;  %1707 = vmatmul.mubr.bf16.vlgmr.msra.gmra.mrb[48].mxu1 %v3573_v38 }
 0x492   :  { %1738 = vmatpush1.bf16.msra.mxu0 %v2836_v36  ;;  %2688 = vmatpush3.bf16.msra.mxu1 %v2839_v37  ;;  %v1201_v44 = vpop.f32.mrb[42].mxu1 }
 0x493   :  { %v1202_v47 = vadd.f32 %v2330_v27, %v1201_v44  ;;  %v2682_v48 = vpop.f32.mrb[43].mxu1  ;;  %1739 = vmatprep.subr.bf16.mxu0 %v2842_v39  ;;  %2689 = vmatprep.subr.bf16.mxu1 %v2976_v41  ;;  %v1215_v50 = vmax.f32 %v1199_v42, 0.0 }
 0x494   :  { %1653 = vmatprep.mubr.bf16.mxu0 %v2978_v26  ;;  %1716 = vmatprep.mubr.bf16.mxu1 %v2978_v26 }
 0x495   :  { %v1216_v51 = vmax.f32 %v1202_v47, 0.0 }
 0x496   :  { %1740 = vmatpush1.bf16.msra.mxu0 %v2840_v45  ;;  %2690 = vmatpush3.bf16.msra.mxu1 %v2843_v46 }
 0x497   :  { %v1220_v54 = vpack.c.bf16 %v1216_v51, %v1215_v50  ;;  %1741 = vmatprep.subr.bf16.mxu0 %v2846_v49  ;;  %2691 = vmatprep.subr.bf16.mxu1 %v2976_v41 }
 0x498   :  { %v1206_v56 = vpop.f32.mrb[44].mxu1 }
 0x499   :  { %v1207_v57 = vadd.f32 %v2330_v27, %v1206_v56  ;;  %v2685_v58 = vpop.f32.mrb[45].mxu1  ;;  %1654 = vmatmul.mubr.bf16.gmra.mrb[52].mxu0 %v1220_v54  ;;  %1717 = vmatmul.mubr.bf16.gmra.mrb[52].mxu1 %v1220_v54  ;;  %v1306_v56 = vsub.s32 4, %v3662_v13 }
 0x49a   :  { %1742 = vmatpush1.bf16.msra.mxu0 %v2844_v52  ;;  %2692 = vmatpush3.bf16.msra.mxu1 %v2847_v53  ;;  %v1209_v59 = vpop.f32.mrb[46].mxu1 }
 0x49b   :  { %v1210_v63 = vadd.f32 %v2330_v27, %v1209_v59  ;;  %v2686_v62 = vpop.f32.mrb[47].mxu1  ;;  %1743 = vmatprep.subr.bf16.mxu0 %v2850_v55  ;;  %2693 = vmatprep.subr.bf16.mxu1 %v2976_v41  ;;  %v1217_v1 = vmax.f32 %v1207_v57, 0.0 }
 0x49c   :  { %1663 = vmatprep.mubr.bf16.mxu0 %v2978_v26  ;;  %1726 = vmatprep.mubr.bf16.mxu1 %v2978_v26 }
 0x49d   :  { %v1218_v2 = vmax.f32 %v1210_v63, 0.0 }
 0x49e   :  { %1744 = vmatpush1.bf16.msra.mxu0 %v2848_v60  ;;  %2694 = vmatpush3.bf16.msra.mxu1 %v2851_v61  ;;  %v1314_v61 = vsub.s32 6, %v3662_v13 }
 0x49f   :  { %v1221_v5 = vpack.c.bf16 %v1218_v2, %v1217_v1  ;;  %1745 = vmatprep.subr.bf16.mxu0 %v2854_v0  ;;  %2695 = vmatprep.subr.bf16.mxu1 %v2976_v41 }
 0x4a0   :  { %v3708_v21 = vrot.slane %v3669_v19, %v1314_v61 }
 0x4a1   :  { %1664 = vmatmul.mubr.bf16.gmra.mrb[56].mxu0 %v1221_v5  ;;  %1727 = vmatmul.mubr.bf16.gmra.mrb[56].mxu1 %v1221_v5 }
 0x4a2   :  { %1746 = vmatpush1.bf16.msra.mxu0 %v2852_v3  ;;  %2696 = vmatpush3.bf16.msra.mxu1 %v2855_v4 }
 0x4a3   :  { %1747 = vmatprep.subr.bf16.mxu0 %v2858_v6  ;;  %2697 = vmatprep.subr.bf16.mxu1 %v2976_v41 }
 0x4a4   :  { %1769 = vmatprep.mubr.bf16.mxu0 %v2978_v26  ;;  %2703 = vmatprep.mubr.msk.bf16.mxu1 %vm2977_vm0, %v2976_v41 }
 0x4a6   :  { %1748 = vmatpush1.bf16.msra.mxu0 %v2856_v7  ;;  %2698 = vmatpush3.bf16.msra.mxu1 %v2859_v8 }
 0x4a7   :  { %1749 = vmatprep.subr.bf16.mxu0 %v2862_v9  ;;  %2699 = vmatprep.subr.bf16.mxu1 %v2976_v41 }
 0x4aa   :  { %1750 = vmatpush1.bf16.msra.mxu0 %v2860_v10  ;;  %2700 = vmatpush3.bf16.msra.mxu1 %v2863_v12 }
 0x4ab   :  { %1751 = vmatprep.subr.bf16.mxu0 %v2866_v11  ;;  %2701 = vmatprep.subr.bf16.mxu1 %v2976_v41  ;;  %v3704_v11 = vrot.slane %v3669_v19, %v1306_v56 }
 0x4ae   :  { %1752 = vmatpush1.bf16.msra.mxu0 %v2864_v14  ;;  %2702 = vmatpush3.bf16.msra.mxu1 %v2867_v15  ;;  %v1310_v14 = vsub.s32 5, %v3662_v13 }
 0x4b1   :  { %1770 = vmatmul.mubr.bf16.vlgmr.msra.gmra.mrb[60].mxu0 %v3573_v38  ;;  %2704 = vmatmul.mubr.bf16.vlgmr.msra.gmra.mrb[60].mxu1 %v3573_v38 }
 0x4b2   :  { %1779 = vmatprep.mubr.bf16.mxu0 %v2978_v26  ;;  %2707 = vmatprep.mubr.msk.bf16.mxu1 %vm2977_vm0, %v2976_v41 }
 0x4b9   :  { %1780 = vmatmul.mubr.bf16.gmra.mrb[64].mxu0 %v1220_v54  ;;  %2708 = vmatmul.mubr.bf16.gmra.mrb[64].mxu1 %v1220_v54 }
 0x4ba   :  { %1789 = vmatprep.mubr.bf16.mxu0 %v2978_v26  ;;  %2711 = vmatprep.mubr.msk.bf16.mxu1 %vm2977_vm0, %v2976_v41  ;;  %v3674_v41 = vrot.slane %v3669_v19, %v1290_v17 }
 0x4c1   :  { %1790 = vmatmul.mubr.bf16.gmra.mrb[68].mxu0 %v1221_v5  ;;  %2712 = vmatmul.mubr.bf16.gmra.mrb[68].mxu1 %v1221_v5 }
 0x564   :  { %v1645_v25 = vpop.f32.mrb[48].mxu0  ;;  %v1708_v26 = vpop.f32.mrb[48].mxu1 }
 0x565   :  { %v1646_v27 = vadd.f32 %v1645_v25, %v3674_v41  ;;  %v1709_v28 = vadd.f32 %v1708_v26, %v3677_v22  ;;  %v1647_v30 = vpop.f32.mrb[49].mxu0  ;;  %v1710_v29 = vpop.f32.mrb[49].mxu1 }
 0x566   :  { %v1648_v31 = vadd.f32 %v1647_v30, %v3680_v23  ;;  %v1711_v32 = vadd.f32 %v1710_v29, %v3683_v24  ;;  %v1649_v33 = vpop.f32.mrb[50].mxu0  ;;  %v1712_v34 = vpop.f32.mrb[50].mxu1 }
 0x567   :  { %v1857_v35 = vmul.f32 0.5, %v1646_v27  ;;  %v1859_v36 = vmul.f32 0.5, %v1709_v28  ;;  %v1650_v37 = vadd.f32 %v1649_v33, %v3674_v41  ;;  %v1713_v38 = vadd.f32 %v1712_v34, %v3677_v22  ;;  %v1651_v39 = vpop.f32.mrb[51].mxu0  ;;  %v1714_v40 = vpop.f32.mrb[51].mxu1 }
 0x568   :  { %v1858_v42 = vmul.f32 0.5, %v1648_v31  ;;  %v1860_v43 = vmul.f32 0.5, %v1711_v32  ;;  %v1652_v44 = vadd.f32 %v1651_v39, %v3680_v23  ;;  %v1715_v45 = vadd.f32 %v1714_v40, %v3683_v24 }
 0x569   :  { %2868 = vtanh.f32 %v1857_v35  ;;  %v1864_v46 = vmul.f32 0.5, %v1650_v37  ;;  %v1866_v47 = vmul.f32 0.5, %v1713_v38 }
 0x56a   :  { %2870 = vtanh.f32 %v1859_v36  ;;  %v1865_v48 = vmul.f32 0.5, %v1652_v44  ;;  %v1867_v49 = vmul.f32 0.5, %v1715_v45 }
 0x56b   :  { %2872 = vtanh.f32 %v1858_v42 }
 0x56c   :  { %2874 = vtanh.f32 %v1860_v43  ;;  %v1655_v50 = vpop.f32.mrb[52].mxu0  ;;  %v1718_v51 = vpop.f32.mrb[52].mxu1 }
 0x56d   :  { %2876 = vtanh.f32 %v1864_v46  ;;  %v1656_v52 = vadd.f32 %v1655_v50, %v3674_v41  ;;  %v1719_v53 = vadd.f32 %v1718_v51, %v3677_v22  ;;  %v1657_v54 = vpop.f32.mrb[53].mxu0  ;;  %v1720_v55 = vpop.f32.mrb[53].mxu1 }
 0x56e   :  { %2878 = vtanh.f32 %v1866_v47  ;;  %v1658_v57 = vadd.f32 %v1657_v54, %v3680_v23  ;;  %v1721_v58 = vadd.f32 %v1720_v55, %v3683_v24  ;;  %v1659_v59 = vpop.f32.mrb[54].mxu0  ;;  %v1722_v60 = vpop.f32.mrb[54].mxu1 }
 0x56f   :  { %2880 = vtanh.f32 %v1865_v48  ;;  %v1871_v63 = vmul.f32 0.5, %v1656_v52  ;;  %v1873_v62 = vmul.f32 0.5, %v1719_v53  ;;  %v1660_v0 = vadd.f32 %v1659_v59, %v3674_v41  ;;  %v1661_v1 = vpop.f32.mrb[55].mxu0  ;;  %v1724_v2 = vpop.f32.mrb[55].mxu1 }
 0x570   :  { %2882 = vtanh.f32 %v1867_v49  ;;  %v1872_v3 = vmul.f32 0.5, %v1658_v57  ;;  %v1874_v4 = vmul.f32 0.5, %v1721_v58  ;;  %v1723_v5 = vadd.f32 %v1722_v60, %v3677_v22 }
 0x571   :  { %2884 = vtanh.f32 %v1871_v63  ;;  %v1878_v6 = vmul.f32 0.5, %v1660_v0  ;;  %v1662_v7 = vadd.f32 %v1661_v1, %v3680_v23  ;;  %v1725_v8 = vadd.f32 %v1724_v2, %v3683_v24 }
 0x572   :  { %2886 = vtanh.f32 %v1873_v62  ;;  %v1880_v9 = vmul.f32 0.5, %v1723_v5 }
 0x573   :  { %v2869_v10 = vpop.eup %2868  ;;  %2888 = vtanh.f32 %v1872_v3  ;;  %v1879_v12 = vmul.f32 0.5, %v1662_v7  ;;  %v1881_v17 = vmul.f32 0.5, %v1725_v8 }
 0x574   :  { %v2871_v15 = vpop.eup %2870  ;;  %v1941_v16 = vadd.f32 1.0, %v2869_v10  ;;  %2890 = vtanh.f32 %v1874_v4  ;;  %v1665_v18 = vpop.f32.mrb[56].mxu0 }
 0x575   :  { %v1728_v20 = vpop.f32.mrb[56].mxu1  ;;  %v2873_v25 = vpop.eup %2872  ;;  %v1943_v26 = vadd.f32 1.0, %v2871_v15  ;;  %2892 = vtanh.f32 %v1878_v6  ;;  %v1666_v27 = vadd.f32 %v1665_v18, %v3674_v41 }
 0x576   :  { %v1729_v28 = vadd.f32 %v1728_v20, %v3677_v22  ;;  %v1667_v30 = vpop.f32.mrb[57].mxu0  ;;  %v1730_v29 = vpop.f32.mrb[57].mxu1  ;;  %v1983_v32 = vmul.f32 0.5, %v1941_v16  ;;  %v1942_v33 = vadd.f32 1.0, %v2873_v25  ;;  %2894 = vtanh.f32 %v1880_v9 }
 0x577   :  { %v2875_v31 = vpop.eup %2874  ;;  %v1668_v34 = vadd.f32 %v1667_v30, %v3680_v23  ;;  %v1669_v35 = vpop.f32.mrb[58].mxu0  ;;  %v1985_v38 = vmul.f32 0.5, %v1943_v26  ;;  %2896 = vtanh.f32 %v1879_v12  ;;  %v1885_v40 = vmul.f32 0.5, %v1666_v27 }
 0x578   :  { %v1732_v36 = vpop.f32.mrb[58].mxu1  ;;  %v2877_v37 = vpop.eup %2876  ;;  %v1944_v39 = vadd.f32 1.0, %v2875_v31  ;;  %v1984_v45 = vmul.f32 0.5, %v1942_v33  ;;  %2898 = vtanh.f32 %v1881_v17  ;;  %v1887_v47 = vmul.f32 0.5, %v1729_v28 }
 0x579   :  { %v1671_v42 = vpop.f32.mrb[59].mxu0  ;;  %v3713_v43 = vpop.f32.mrb[59].mxu1  ;;  %v1948_v46 = vadd.f32 1.0, %v2877_v37  ;;  %2900 = vtanh.f32 %v1885_v40  ;;  %v1886_v51 = vmul.f32 0.5, %v1668_v34  ;;  %v1731_v62 = vadd.f32 %v1730_v29, %v3683_v24 }
 0x57a   :  { %v2879_v44 = vpop.eup %2878  ;;  %v1986_v49 = vmul.f32 0.5, %v1944_v39  ;;  %v2418_v53 = vpack.c.bf16 %v1984_v45, %v1983_v32  ;;  %2902 = vtanh.f32 %v1887_v47  ;;  %v1670_v0 = vadd.f32 %v1669_v35, %v3674_v41 }
 0x57b   :  { %v2881_v48 = vpop.eup %2880  ;;  %v1950_v50 = vadd.f32 1.0, %v2879_v44  ;;  %v1990_v54 = vmul.f32 0.5, %v1948_v46  ;;  %2904 = vtanh.f32 %v1886_v51  ;;  %v1733_v4 = vadd.f32 %v1732_v36, %v3677_v22 }
 0x57c   :  { %v2883_v52 = vpop.eup %2882  ;;  %v1949_v55 = vadd.f32 1.0, %v2881_v48  ;;  %v2419_v57 = vpack.c.bf16 %v1986_v49, %v1985_v38  ;;  %2157 = vst [vmem:[#allocation2] sm:$0xff] %v2418_v53  ;;  %v1672_v5 = vadd.f32 %v1671_v42, %v3680_v23  ;;  %v1888_v10 = vmul.f32 0.5, %v1731_v62 }
 0x57d   :  { %v2885_v56 = vpop.eup %2884  ;;  %v1992_v58 = vmul.f32 0.5, %v1950_v50  ;;  %v1951_v59 = vadd.f32 1.0, %v2883_v52  ;;  %v1892_v18 = vmul.f32 0.5, %v1670_v0  ;;  %v1894_v26 = vmul.f32 0.5, %v1733_v4 }
 0x57e   :  { %v2887_v60 = vpop.eup %2886  ;;  %v1991_v61 = vmul.f32 0.5, %v1949_v55  ;;  %v1955_v63 = vadd.f32 1.0, %v2885_v56  ;;  %2158 = vst [vmem:[#allocation2 + $0x8] sm:$0xff] %v2419_v57  ;;  %2906 = vtanh.f32 %v1888_v10  ;;  %v1893_v28 = vmul.f32 0.5, %v1672_v5 }
 0x57f   :  { %v2889_v1 = vpop.eup %2888  ;;  %v1993_v2 = vmul.f32 0.5, %v1951_v59  ;;  %v1957_v3 = vadd.f32 1.0, %v2887_v60  ;;  %2908 = vtanh.f32 %v1892_v18  ;;  %v1735_v40 = vadd.f32 %v3713_v43, %v3683_v24 }
 0x580   :  { %v2891_v6 = vpop.eup %2890  ;;  %v2422_v7 = vpack.c.bf16 %v1991_v61, %v1990_v54  ;;  %v1997_v8 = vmul.f32 0.5, %v1955_v63  ;;  %v1956_v9 = vadd.f32 1.0, %v2889_v1  ;;  %2910 = vtanh.f32 %v1894_v26 }
 0x581   :  { %v2893_v12 = vpop.eup %2892  ;;  %v2423_v15 = vpack.c.bf16 %v1993_v2, %v1992_v58  ;;  %v1999_v16 = vmul.f32 0.5, %v1957_v3  ;;  %v1958_v17 = vadd.f32 1.0, %v2891_v6  ;;  %2912 = vtanh.f32 %v1893_v28 }
 0x582   :  { %v2895_v20 = vpop.eup %2894  ;;  %2162 = vst [vmem:[#allocation2 + $0x1c] sm:$0xff] %v2422_v7  ;;  %v1998_v41 = vmul.f32 0.5, %v1956_v9  ;;  %v1962_v25 = vadd.f32 1.0, %v2893_v12  ;;  %v3724_v45 = vrot.slane %v3669_v19, %v1310_v14  ;;  %v1895_v24 = vmul.f32 0.5, %v1735_v40 }
 0x583   :  { %v2897_v27 = vpop.eup %2896  ;;  %2163 = vst [vmem:[#allocation2 + $0x24] sm:$0xff] %v2423_v15  ;;  %v2000_v22 = vmul.f32 0.5, %v1958_v17  ;;  %v1964_v23 = vadd.f32 1.0, %v2895_v20 }
 0x584   :  { %v2899_v30 = vpop.eup %2898  ;;  %v2426_v29 = vpack.c.bf16 %v1998_v41, %v1997_v8  ;;  %v2004_v31 = vmul.f32 0.5, %v1962_v25  ;;  %v1963_v32 = vadd.f32 1.0, %v2897_v27  ;;  %v1771_v42 = vpop.f32.mrb[60].mxu0  ;;  %2914 = vtanh.f32 %v1895_v24 }
 0x585   :  { %v2901_v33 = vpop.eup %2900  ;;  %v2427_v34 = vpack.c.bf16 %v2000_v22, %v1999_v16  ;;  %v2006_v35 = vmul.f32 0.5, %v1964_v23  ;;  %v1965_v36 = vadd.f32 1.0, %v2899_v30  ;;  %v1834_v44 = vpop.f32.mrb[60].mxu1  ;;  %v1772_v48 = vadd.f32 %v1771_v42, %v3704_v11 }
 0x586   :  { %v2903_v37 = vpop.eup %2902  ;;  %2166 = vst [vmem:[#allocation2 + $0x38] sm:$0xff] %v2426_v29  ;;  %v2005_v38 = vmul.f32 0.5, %v1963_v32  ;;  %v1969_v39 = vadd.f32 1.0, %v2901_v33  ;;  %v1835_v49 = vadd.f32 %v1834_v44, %v3708_v21  ;;  %v1773_v50 = vpop.f32.mrb[61].mxu0 }
 0x587   :  { %v2905_v46 = vpop.eup %2904  ;;  %2167 = vst [vmem:[#allocation2 + $0x40] sm:$0xff] %v2427_v34  ;;  %v2007_v47 = vmul.f32 0.5, %v1965_v36  ;;  %v2705_v51 = vpop.f32.mrb[61].mxu1  ;;  %v1971_v13 = vadd.f32 1.0, %v2903_v37  ;;  %v1861_v57 = vmul.f32 0.5, %v1772_v48  ;;  %v1774_v60 = vadd.f32 %v1773_v50, %v3724_v45 }
 0x588   :  { %v2430_v52 = vpack.c.bf16 %v2005_v38, %v2004_v31  ;;  %v2011_v53 = vmul.f32 0.5, %v1969_v39  ;;  %v1970_v54 = vadd.f32 1.0, %v2905_v46  ;;  %v1775_v43 = vpop.f32.mrb[62].mxu0  ;;  %v1837_v55 = vpop.f32.mrb[62].mxu1  ;;  %v1863_v19 = vmul.f32 0.5, %v1835_v49 }
 0x589   :  { %v2431_v56 = vpack.c.bf16 %v2007_v47, %v2006_v35  ;;  %v1777_v14 = vpop.f32.mrb[63].mxu0  ;;  %v2706_v58 = vpop.f32.mrb[63].mxu1  ;;  %v1776_v61 = vadd.f32 %v1775_v43, %v3704_v11  ;;  %2916 = vtanh.f32 %v1861_v57  ;;  %v1838_v63 = vadd.f32 %v1837_v55, %v3708_v21 }
 0x58a   :  { %2170 = vst [vmem:[#allocation2 + $0x54] sm:$0xff] %v2430_v52  ;;  %v2012_v59 = vmul.f32 0.5, %v1970_v54  ;;  %v1778_v62 = vadd.f32 %v1777_v14, %v3724_v45  ;;  %v2907_v0 = vpop.eup %2906  ;;  %2918 = vtanh.f32 %v1863_v19  ;;  %v1862_v2 = vmul.f32 0.5, %v1774_v60 }
 0x58b   :  { %2171 = vst [vmem:[#allocation2 + $0x5c] sm:$0xff] %v2431_v56  ;;  %v1868_v3 = vmul.f32 0.5, %v1776_v61  ;;  %v2909_v4 = vpop.eup %2908  ;;  %v2013_v5 = vmul.f32 0.5, %v1971_v13  ;;  %v1972_v6 = vadd.f32 1.0, %v2907_v0  ;;  %v1870_v7 = vmul.f32 0.5, %v1838_v63 }
 0x58c   :  { %v2434_v1 = vpack.c.bf16 %v2012_v59, %v2011_v53  ;;  %v1869_v8 = vmul.f32 0.5, %v1778_v62  ;;  %v2911_v9 = vpop.eup %2910  ;;  %v1976_v10 = vadd.f32 1.0, %v2909_v4  ;;  %2920 = vtanh.f32 %v1862_v2  ;;  %v1781_v12 = vpop.f32.mrb[64].mxu0 }
 0x58d   :  { %v1842_v15 = vpop.f32.mrb[64].mxu1  ;;  %v2913_v16 = vpop.eup %2912  ;;  %v2014_v17 = vmul.f32 0.5, %v1972_v6  ;;  %2922 = vtanh.f32 %v1868_v3  ;;  %v1782_v18 = vadd.f32 %v1781_v12, %v3704_v11  ;;  %v1978_v30 = vadd.f32 1.0, %v2911_v9 }
 0x58e   :  { %2174 = vst [vmem:[#allocation2 + $0x70] sm:$0xff] %v2434_v1  ;;  %v1783_v20 = vpop.f32.mrb[65].mxu0  ;;  %v2709_v41 = vpop.f32.mrb[65].mxu1  ;;  %v2018_v25 = vmul.f32 0.5, %v1976_v10  ;;  %v1977_v26 = vadd.f32 1.0, %v2913_v16  ;;  %2924 = vtanh.f32 %v1870_v7  ;;  %v1843_v27 = vadd.f32 %v1842_v15, %v3708_v21 }
 0x58f   :  { %v1785_v22 = vpop.f32.mrb[66].mxu0  ;;  %v1845_v23 = vpop.f32.mrb[66].mxu1  ;;  %v2435_v28 = vpack.c.bf16 %v2014_v17, %v2013_v5  ;;  %2926 = vtanh.f32 %v1869_v8  ;;  %v1875_v29 = vmul.f32 0.5, %v1782_v18  ;;  %v1784_v35 = vadd.f32 %v1783_v20, %v3724_v45 }
 0x590   :  { %v1787_v31 = vpop.f32.mrb[67].mxu0  ;;  %v2710_v32 = vpop.f32.mrb[67].mxu1  ;;  %v2019_v33 = vmul.f32 0.5, %v1977_v26  ;;  %v1877_v34 = vmul.f32 0.5, %v1843_v27  ;;  %v1786_v36 = vadd.f32 %v1785_v22, %v3704_v11  ;;  %v1846_v37 = vadd.f32 %v1845_v23, %v3708_v21 }
 0x591   :  { %2175 = vst [vmem:[#allocation2 + $0x78] sm:$0xff] %v2435_v28  ;;  %2928 = vtanh.f32 %v1875_v29  ;;  %v1788_v38 = vadd.f32 %v1787_v31, %v3724_v45  ;;  %v2915_v39 = vpop.eup %2914  ;;  %v1876_v42 = vmul.f32 0.5, %v1784_v35  ;;  %v2020_v47 = vmul.f32 0.5, %v1978_v30 }
 0x592   :  { %v2438_v40 = vpack.c.bf16 %v2019_v33, %v2018_v25  ;;  %2930 = vtanh.f32 %v1877_v34  ;;  %v1882_v44 = vmul.f32 0.5, %v1786_v36  ;;  %v1979_v48 = vadd.f32 1.0, %v2915_v39 }
 0x593   :  { %v2917_v46 = vpop.eup %2916  ;;  %v1884_v49 = vmul.f32 0.5, %v1846_v37  ;;  %v1883_v50 = vmul.f32 0.5, %v1788_v38  ;;  %2932 = vtanh.f32 %v1876_v42 }
 0x594   :  { %v2919_v51 = vpop.eup %2918  ;;  %2178 = vst [vmem:[#allocation2 + $0x8c] sm:$0xff] %v2438_v40  ;;  %v1945_v52 = vadd.f32 1.0, %v2917_v46  ;;  %v1791_v53 = vpop.f32.mrb[68].mxu0  ;;  %v2021_v24 = vmul.f32 0.5, %v1979_v48  ;;  %2934 = vtanh.f32 %v1882_v44 }
 0x595   :  { %v1850_v54 = vpop.f32.mrb[68].mxu1  ;;  %v1947_v43 = vadd.f32 1.0, %v2919_v51  ;;  %v1792_v55 = vadd.f32 %v1791_v53, %v3704_v11  ;;  %v1793_v56 = vpop.f32.mrb[69].mxu0  ;;  %2936 = vtanh.f32 %v1884_v49 }
 0x596   :  { %v2713_v13 = vpop.f32.mrb[69].mxu1  ;;  %v2921_v57 = vpop.eup %2920  ;;  %v1987_v19 = vmul.f32 0.5, %v1945_v52  ;;  %v1851_v14 = vadd.f32 %v1850_v54, %v3708_v21  ;;  %v1794_v58 = vadd.f32 %v1793_v56, %v3724_v45  ;;  %v2439_v63 = vpack.c.bf16 %v2021_v24, %v2020_v47 }
 0x597   :  { %v1795_v59 = vpop.f32.mrb[70].mxu0  ;;  %v1853_v60 = vpop.f32.mrb[70].mxu1  ;;  %v1989_v62 = vmul.f32 0.5, %v1947_v43  ;;  %v1946_v0 = vadd.f32 1.0, %v2921_v57  ;;  %2938 = vtanh.f32 %v1883_v50  ;;  %v1889_v5 = vmul.f32 0.5, %v1792_v55 }
 0x598   :  { %v2923_v61 = vpop.eup %2922  ;;  %v1797_v1 = vpop.f32.mrb[71].mxu0  ;;  %v1891_v6 = vmul.f32 0.5, %v1851_v14  ;;  %v1890_v7 = vmul.f32 0.5, %v1794_v58  ;;  %2179 = vst [vmem:[#allocation2 + $0x94] sm:$0xff] %v2439_v63  ;;  %v1796_v15 = vadd.f32 %v1795_v59, %v3704_v11  ;;  %v1854_v18 = vadd.f32 %v1853_v60, %v3708_v21 }
 0x599   :  { %v2714_v2 = vpop.f32.mrb[71].mxu1  ;;  %v2925_v3 = vpop.eup %2924  ;;  %v1952_v4 = vadd.f32 1.0, %v2923_v61  ;;  %v2421_v9 = vpack.c.bf16 %v1989_v62, %v1989_v62  ;;  %v1988_v10 = vmul.f32 0.5, %v1946_v0  ;;  %2940 = vtanh.f32 %v1889_v5 }
 0x59a   :  { %v2927_v8 = vpop.eup %2926  ;;  %v1954_v12 = vadd.f32 1.0, %v2925_v3  ;;  %2942 = vtanh.f32 %v1891_v6  ;;  %v1896_v26 = vmul.f32 0.5, %v1796_v15  ;;  %v1898_v28 = vmul.f32 0.5, %v1854_v18 }
 0x59b   :  { %v1994_v16 = vmul.f32 0.5, %v1952_v4  ;;  %v1953_v17 = vadd.f32 1.0, %v2927_v8  ;;  %v2929_v20 = vpop.eup %2928  ;;  %2161 = vst.msk [vmem:[#allocation2 + $0x18] sm:$0xf] %vm2160_vm4, %v2421_v9  ;;  %v2420_v41 = vpack.c.bf16 %v1988_v10, %v1987_v19  ;;  %2944 = vtanh.f32 %v1890_v7 }
 0x59c   :  { %v1996_v25 = vmul.f32 0.5, %v1954_v12  ;;  %v2931_v27 = vpop.eup %2930  ;;  %v1959_v23 = vadd.f32 1.0, %v2929_v20  ;;  %2946 = vtanh.f32 %v1896_v26  ;;  %v1798_v29 = vadd.f32 %v1797_v1, %v3724_v45 }
 0x59d   :  { %v1995_v22 = vmul.f32 0.5, %v1953_v17  ;;  %2159 = vst [vmem:[#allocation2 + $0x10] sm:$0xff] %v2420_v41  ;;  %v1961_v11 = vadd.f32 1.0, %v2931_v27  ;;  %v2933_v31 = vpop.eup %2932  ;;  %2948 = vtanh.f32 %v1898_v28 }
 0x59e   :  { %v2425_v30 = vpack.c.bf16 %v1996_v25, %v1996_v25  ;;  %v2935_v32 = vpop.eup %2934  ;;  %v2001_v33 = vmul.f32 0.5, %v1959_v23  ;;  %v1960_v35 = vadd.f32 1.0, %v2933_v31  ;;  %v1897_v36 = vmul.f32 0.5, %v1798_v29 }
 0x59f   :  { %v2424_v21 = vpack.c.bf16 %v1995_v22, %v1994_v16  ;;  %v2003_v34 = vmul.f32 0.5, %v1961_v11  ;;  %v2937_v37 = vpop.eup %2936  ;;  %v1966_v38 = vadd.f32 1.0, %v2935_v32 }
 0x5a0   :  { %2165 = vst.msk [vmem:[#allocation2 + $0x34] sm:$0xf] %vm2160_vm4, %v2425_v30  ;;  %v2002_v42 = vmul.f32 0.5, %v1960_v35  ;;  %v1968_v44 = vadd.f32 1.0, %v2937_v37  ;;  %2950 = vtanh.f32 %v1897_v36 }
 0x5a1   :  { %2164 = vst [vmem:[#allocation2 + $0x2c] sm:$0xff] %v2424_v21  ;;  %v2939_v39 = vpop.eup %2938  ;;  %v2429_v40 = vpack.c.bf16 %v2003_v34, %v2003_v34  ;;  %v2008_v46 = vmul.f32 0.5, %v1966_v38 }
 0x5a2   :  { %v1967_v45 = vadd.f32 1.0, %v2939_v39  ;;  %v2428_v47 = vpack.c.bf16 %v2002_v42, %v2001_v33  ;;  %v2010_v48 = vmul.f32 0.5, %v1968_v44 }
 0x5a3   :  { %2169 = vst.msk [vmem:[#allocation2 + $0x50] sm:$0xf] %vm2160_vm4, %v2429_v40  ;;  %v2941_v49 = vpop.eup %2940 }
 0x5a4   :  { %v2009_v50 = vmul.f32 0.5, %v1967_v45  ;;  %v2943_v51 = vpop.eup %2942  ;;  %2168 = vst [vmem:[#allocation2 + $0x48] sm:$0xff] %v2428_v47  ;;  %v2433_v52 = vpack.c.bf16 %v2010_v48, %v2010_v48  ;;  %v1973_v53 = vadd.f32 1.0, %v2941_v49 }
 0x5a5   :  { %v2945_v54 = vpop.eup %2944  ;;  %v1975_v43 = vadd.f32 1.0, %v2943_v51 }
 0x5a6   :  { %v2432_v24 = vpack.c.bf16 %v2009_v50, %v2008_v46  ;;  %v2947_v55 = vpop.eup %2946  ;;  %2173 = vst.msk [vmem:[#allocation2 + $0x6c] sm:$0xf] %vm2160_vm4, %v2433_v52  ;;  %v2015_v56 = vmul.f32 0.5, %v1973_v53  ;;  %v1974_v13 = vadd.f32 1.0, %v2945_v54 }
 0x5a7   :  { %v2949_v57 = vpop.eup %2948  ;;  %v2017_v19 = vmul.f32 0.5, %v1975_v43  ;;  %v1980_v14 = vadd.f32 1.0, %v2947_v55 }
 0x5a8   :  { %2172 = vst [vmem:[#allocation2 + $0x64] sm:$0xff] %v2432_v24  ;;  %v2016_v58 = vmul.f32 0.5, %v1974_v13  ;;  %v1982_v59 = vadd.f32 1.0, %v2949_v57 }
 0x5a9   :  { %v2437_v60 = vpack.c.bf16 %v2017_v19, %v2017_v19  ;;  %v2022_v0 = vmul.f32 0.5, %v1980_v14 }
 0x5aa   :  { %v2951_v61 = vpop.eup %2950  ;;  %v2436_v63 = vpack.c.bf16 %v2016_v58, %v2015_v56  ;;  %v2024_v62 = vmul.f32 0.5, %v1982_v59 }
 0x5ab   :  { %2177 = vst.msk [vmem:[#allocation2 + $0x88] sm:$0xf] %vm2160_vm4, %v2437_v60  ;;  %v1981_v1 = vadd.f32 1.0, %v2951_v61 }
 0x5ac   :  { %2176 = vst [vmem:[#allocation2 + $0x80] sm:$0xff] %v2436_v63  ;;  %v2441_v2 = vpack.c.bf16 %v2024_v62, %v2024_v62 }
 0x5ad   :  { %v2023_v3 = vmul.f32 0.5, %v1981_v1 }
 0x5ae   :  { %2181 = vst.msk [vmem:[#allocation2 + $0xa4] sm:$0xf] %vm2160_vm4, %v2441_v2 }
 0x5af   :  { %v2440_v4 = vpack.c.bf16 %v2023_v3, %v2022_v0 }
 0x5b1   :  { %2180 = vst [vmem:[#allocation2 + $0x9c] sm:$0xff] %v2440_v4 }
 0x5b2   :  { %2186 = vsyncadd [#allocation3], 448  ;;  %v2231_v5 = vld [vmem:[#allocation4] sm:$0xff]  ;;  %v2233_v6 = vld [vmem:[#allocation4 + $0x8] sm:$0xff]  ;;  %s2979_s12 = smov [#allocation2]  }
 0x5b3   :  { %s2187_s24 = sshll.u32 %s2979_s12, 4  ;;  %2232 = vst [vmem:[%s3791_s14] sm:$0xff] %v2231_v5  ;;  %2234 = vst [vmem:[%s3791_s14 + $0x8] sm:$0xff] %v2233_v6  ;;  %v2235_v7 = vld [vmem:[#allocation4 + $0x10] sm:$0xff]  ;;  %v2237_v8 = vld [vmem:[#allocation4 + $0x18] sm:$0xff]  ;;  %s2188_s24 = int_to_ptr.vmem [resolvable:$true] %s2187_s24 }
 0x5b4   :  { %v2239_v9 = vld [vmem:[#allocation4 + $0x20] sm:$0xff]  ;;  %2236 = vst [vmem:[%s3791_s14 + $0x10] sm:$0xff] %v2235_v7  ;;  %2238 = vst [vmem:[%s3791_s14 + $0x18] sm:$0xff] %v2237_v8  ;;  %s2952_s15 = scalar_lea.vmem %s2188_s24, 2240  ;;  %s2956_s10 = scalar_lea.vmem %s2188_s24, 2688 }
 0x5b5   :  { %2240 = vst [vmem:[%s3791_s14 + $0x20] sm:$0xff] %v2239_v9  ;;  %p2953_p0 = scmp.ne.s32.totalorder %s2188_s24, %s2952_s15  ;;  %p2957_p1 = scmp.lt.s32.totalorder %s2188_s24, %s2188_s24 }
 0x5b6   :  { %p2958_p2 = scmp.lt.s32.totalorder %s2956_s10, %s2952_s15 }
 0x5b8   :  { %p2959_p3 = por %p2958_p2, %p2957_p1 }
 0x5ba   :  { %p2960_p4 = pnand %p2959_p3, %p2953_p0 }
 0x5bc   :  { %2963 = shalt.err (!%p2960_p4)
}
 0x5bd   :  { %s2964_s17 = scalar_lea.hbm %s3790_s13, 2240 }
 0x5be   :  { %p2965_p5 = scmp.ne.s32.totalorder %s3790_s13, %s2964_s17  ;;  %p2968_p6 = scmp.lt.u32.totalorder %s2964_s17, %s3790_s13 }
 0x5c0   :  { %p2970_p7 = pnand %p2968_p6, %p2965_p5 }
 0x5c2   :  { %2973 = shalt.err (!%p2970_p7)
}
 0x5c3   :  { %s2980_s14 = smov 448   ;;  %s2981_s20 = smov 28  }
 0x5c4   :  { %2193 = dma.vmem_to_hbm [thread:$0]  %s2188_s24, 2240, %s3790_s13, [#allocation3], %s2980_s14, %s2980_s14, %s2981_s20  }
 0x5c5   :  { %2974 = dma.done.wait [#allocation3], 2688  }
 0x5c6   :  { %2975 = vsyncadd [#allocation3], 4294964608 }
 0x5c7   :  { %2249 = vsyncpa [#allocation3], 1 }

</bundles_post_ra>
